<compile_context>
chip_gen: v5e
topology: v5e:2x2
jax: 0.10.0
libtpu: 0.0.40
codegen_flags: <defaults>
</compile_context>

<pallas_src>
import jax
import jax.numpy as jnp
from jax.experimental import pallas as pl
from jax.experimental.pallas import tpu as pltpu

# dtype used for MXU operands (accumulation is always f32).  Set to jnp.float32 for
# bit-closer parity with PyTorch f32 at the cost of ~2x MXU rate / HBM traffic.
_MM_DTYPE = jnp.bfloat16

# ConvTranspose2d(k=4, s=2, p=1) sub-pixel taps.
# For output parity p (0 = even output index, 1 = odd), the contributing
# (kernel index, window offset) pairs; the window offset indexes the 1-zero-padded input.
_T_TAPS = (((1, 1), (3, 0)),   # even outputs
           ((0, 2), (2, 1)))   # odd outputs


# ------------------------------------------------------------------
# Kernel 1: ConvTranspose2d(4, stride=2, pad=1), taps folded into K,
# output written directly in parity-split (interleave-ready) layout.
# ------------------------------------------------------------------
def _upconv_kernel(xmain_ref, xhalo_ref, w_ref, b_ref, out_ref):
    # xmain: (1, Ht, W+2, Cin)   padded-input rows [t*Ht, t*Ht+Ht)
    # xhalo: (1, 2,  W+2, Cin)   padded-input rows [t*Ht+Ht, t*Ht+Ht+2)
    # w    : (4, 4*Cin, Cout)    2x2 taps folded into K, one slab per output parity (2r+s)
    # b    : (1, Cout)
    # out  : (1, Ht, 2, W, 2, Cout)  == rows [2*t*Ht, 2*(t+1)*Ht) of `up`, parity-split
    xwin = jnp.concatenate([xmain_ref[...], xhalo_ref[...]], axis=1)   # (1, Ht+2, W+2, Cin)
    _, hw, wp2, cin = xwin.shape
    ht, wsp = hw - 2, wp2 - 2
    cout = out_ref.shape[-1]

    xw = xwin.astype(_MM_DTYPE)
    wts = w_ref[...].astype(_MM_DTYPE)
    bias = b_ref[...]                                                  # (1, Cout) f32

    for r in (0, 1):
        for s in (0, 1):
            views = [xw[:, dh:dh + ht, dw:dw + wsp, :]
                     for (_, dh) in _T_TAPS[r] for (_, dw) in _T_TAPS[s]]
            xk = jnp.concatenate(views, axis=-1).reshape(ht * wsp, 4 * cin)
            acc = jnp.dot(xk, wts[2 * r + s],
                          preferred_element_type=jnp.float32) + bias   # (Ht*W, Cout) f32
            out_ref[:, :, r, :, s, :] = acc.reshape(1, ht, wsp, cout)


# ------------------------------------------------------------------
# Kernel 2: Conv2d(3x3, pad=1) with kw taps folded into K, plus per-tile
# BatchNorm partial statistics (sum, sum-of-squares) -- phase 1 of BN.
# ------------------------------------------------------------------
def _conv_stats_kernel(xmain_ref, xhalo_ref, w_ref, b_ref, out_ref, stats_ref):
    # xmain: (1, Hot, 2W+2, Cm)  padded merged-map rows [t*Hot, (t+1)*Hot)
    # xhalo: (1, 2,   2W+2, Cm)  padded merged-map rows [(t+1)*Hot, (t+1)*Hot+2)
    # w    : (3, 3*Cm, Cout)     kw taps folded into K, one slab per kh
    # b    : (1, Cout)
    # out  : (1, Hot, 2W, Cout)  pre-BN conv output
    # stats: (1, 1, 2, Cout)     per-tile [sum, sum-of-squares]
    xwin = jnp.concatenate([xmain_ref[...], xhalo_ref[...]], axis=1)   # (1, Hot+2, 2W+2, Cm)
    _, hw, wp2, cm = xwin.shape
    hot, wo = hw - 2, wp2 - 2
    cout = out_ref.shape[-1]

    xw = xwin.astype(_MM_DTYPE)
    wts = w_ref[...].astype(_MM_DTYPE)

    acc = jnp.zeros((hot * wo, cout), jnp.float32)
    for kh in range(3):
        xk = jnp.concatenate(
            [xw[:, kh:kh + hot, kw:kw + wo, :] for kw in range(3)], axis=-1
        ).reshape(hot * wo, 3 * cm)
        acc = acc + jnp.dot(xk, wts[kh], preferred_element_type=jnp.float32)
    acc = acc + b_ref[...]

    out_ref[...] = acc.reshape(1, hot, wo, cout)
    ssum = jnp.sum(acc, axis=0, keepdims=True)          # (1, Cout)
    ssq = jnp.sum(acc * acc, axis=0, keepdims=True)     # (1, Cout)
    stats_ref[...] = jnp.concatenate([ssum, ssq], axis=0).reshape(1, 1, 2, cout)


# ------------------------------------------------------------------
# Kernel 3: BatchNorm normalize (from precomputed scale/shift) + LeakyReLU(0.01)
# -- phase 2 of BN, fully parallel over tiles.
# ------------------------------------------------------------------
def _bn_lrelu_kernel(x_ref, scale_ref, shift_ref, out_ref):
    x = x_ref[...]                                       # (1, Hot, 2W, Cout)
    y = x * scale_ref[...] + shift_ref[...]              # (1, Cout) broadcasts over lanes
    out_ref[...] = jnp.where(y >= 0, y, 0.01 * y)


# ------------------------------------------------------------------
# Wrapper (PyTorch-like NCHW interface)
# ------------------------------------------------------------------
def init_unet_up_block_params(key, in_channels, out_channels):
    k1, k2, k3, k4 = jax.random.split(key, 4)
    return {
        # nn.ConvTranspose2d(in, out, 4, 2, 1): weight (in, out, 4, 4)
        "upconv_w": 0.1 * jax.random.normal(k1, (in_channels, out_channels, 4, 4), jnp.float32),
        "upconv_b": 0.1 * jax.random.normal(k2, (out_channels,), jnp.float32),
        # nn.Conv2d(2*out, out, 3, 1, 1): weight (out, 2*out, 3, 3)
        "conv1_w": 0.1 * jax.random.normal(k3, (out_channels, 2 * out_channels, 3, 3), jnp.float32),
        "conv1_b": 0.1 * jax.random.normal(k4, (out_channels,), jnp.float32),
        # nn.BatchNorm2d(out)
        "bn_gamma": jnp.ones((out_channels,), jnp.float32),
        "bn_beta": jnp.zeros((out_channels,), jnp.float32),
    }


def _pick_row_tile(extent, cap=128):
    """Largest even divisor of `extent` that is <= cap (even => 2-row halo block is blockable)."""
    best = None
    d = 2
    while d <= extent and d <= cap:
        if extent % d == 0:
            best = d
        d += 2
    if best is None:
        raise ValueError(f"need an even row-tile dividing {extent}")
    return best


def unet_up_block_forward(params, from_up_nchw, from_down_nchw,
                          *, row_tile_up=None, row_tile_conv=None):
    # NCHW -> NHWC for the kernels
    x_up = jnp.transpose(from_up_nchw, (0, 2, 3, 1)).astype(jnp.float32)      # (N, H, W, Cin)
    x_down = jnp.transpose(from_down_nchw, (0, 2, 3, 1)).astype(jnp.float32)  # (N, 2H, 2W, Cout)
    N, H, W, Cin = x_up.shape
    Cout = params["upconv_w"].shape[1]
    Cm = 2 * Cout

    # Row tiles (even divisors so the 2-row halo lands on a block-of-2 boundary).
    # Caps would normally be derived from the per-chip VMEM budget (smaller on v7x's 64 MiB).
    Ht = row_tile_up if row_tile_up is not None else _pick_row_tile(H)
    Hot = row_tile_conv if row_tile_conv is not None else _pick_row_tile(2 * H)
    assert H % Ht == 0 and Ht % 2 == 0
    assert (2 * H) % Hot == 0 and Hot % 2 == 0
    T1 = H // Ht
    T2 = (2 * H) // Hot

    cparams = pltpu.CompilerParams(
        dimension_semantics=("parallel", "parallel"),   # 2 TCs on v7x; harmless on v5e/v6e
        vmem_limit_bytes=48 * 1024 * 1024,
    )

    # ---- Stage 1: ConvTranspose2d(4, 2, 1), taps folded into K, parity-split output ----
    xpad = jnp.pad(x_up, ((0, 0), (1, 1), (1, 1), (0, 0)))            # (N, H+2, W+2, Cin)
    w_t = jnp.transpose(params["upconv_w"], (2, 3, 0, 1))             # (4, 4, Cin, Cout)
    w_fold = jnp.stack([
        jnp.concatenate([w_t[kh, kw]
                         for (kh, _) in _T_TAPS[r] for (kw, _) in _T_TAPS[s]], axis=0)
        for r in (0, 1) for s in (0, 1)
    ], axis=0)                                                        # (4, 4*Cin, Cout)

    up6 = pl.pallas_call(
        _upconv_kernel,
        grid=(N, T1),
        in_specs=[
            pl.BlockSpec((1, Ht, W + 2, Cin), lambda b, t: (b, t, 0, 0)),
            pl.BlockSpec((1, 2, W + 2, Cin), lambda b, t: (b, (t + 1) * (Ht // 2), 0, 0)),
            pl.BlockSpec((4, 4 * Cin, Cout), lambda b, t: (0, 0, 0)),
            pl.BlockSpec((1, Cout), lambda b, t: (0, 0)),
        ],
        out_specs=pl.BlockSpec((1, Ht, 2, W, 2, Cout), lambda b, t: (b, t, 0, 0, 0, 0)),
        out_shape=jax.ShapeDtypeStruct((N, H, 2, W, 2, Cout), jnp.float32),
        compiler_params=cparams,
    )(xpad, xpad, w_fold, params["upconv_b"].reshape(1, Cout))

    # Parity-split layout -> interleaved map: contiguous reinterpretation (no transpose pass).
    up = up6.reshape(N, 2 * H, 2 * W, Cout)

    # ---- merge + pad for the 3x3 conv ----
    # TODO(synk): fuse this concat+pad into the conv kernel (split-K over up / x_down with
    # in-kernel border handling) to save one more full HBM pass of the merged feature map.
    xcat = jnp.concatenate([up, x_down], axis=-1)                     # (N, 2H, 2W, Cm)
    xcat_pad = jnp.pad(xcat, ((0, 0), (1, 1), (1, 1), (0, 0)))        # (N, 2H+2, 2W+2, Cm)

    # ---- Stage 2: Conv2d(3x3, pad=1) + BN partial stats ----
    w_c = jnp.transpose(params["conv1_w"], (2, 3, 1, 0))              # (3, 3, Cm, Cout)
    w_cfold = w_c.reshape(3, 3 * Cm, Cout)                            # kw folded into K

    conv_out, stats = pl.pallas_call(
        _conv_stats_kernel,
        grid=(N, T2),
        in_specs=[
            pl.BlockSpec((1, Hot, 2 * W + 2, Cm), lambda b, t: (b, t, 0, 0)),
            pl.BlockSpec((1, 2, 2 * W + 2, Cm), lambda b, t: (b, (t + 1) * (Hot // 2), 0, 0)),
            pl.BlockSpec((3, 3 * Cm, Cout), lambda b, t: (0, 0, 0)),
            pl.BlockSpec((1, Cout), lambda b, t: (0, 0)),
        ],
        out_specs=(
            pl.BlockSpec((1, Hot, 2 * W, Cout), lambda b, t: (b, t, 0, 0)),
            pl.BlockSpec((1, 1, 2, Cout), lambda b, t: (b, t, 0, 0)),
        ),
        out_shape=(
            jax.ShapeDtypeStruct((N, 2 * H, 2 * W, Cout), jnp.float32),
            jax.ShapeDtypeStruct((N, T2, 2, Cout), jnp.float32),
        ),
        compiler_params=cparams,
    )(xcat_pad, xcat_pad, w_cfold, params["conv1_b"].reshape(1, Cout))

    # ---- BN global statistics (tiny XLA reduction over per-tile partials) ----
    count = jnp.float32(N * (2 * H) * (2 * W))
    totals = jnp.sum(stats, axis=(0, 1))                              # (2, Cout)
    mean = totals[0] / count
    var = totals[1] / count - mean * mean                             # biased var (train-mode BN)
    inv = jax.lax.rsqrt(var + 1e-5)
    scale = (params["bn_gamma"] * inv).reshape(1, Cout)
    shift = (params["bn_beta"] - mean * params["bn_gamma"] * inv).reshape(1, Cout)

    # ---- Stage 3: normalize + LeakyReLU ----
    y = pl.pallas_call(
        _bn_lrelu_kernel,
        grid=(N, T2),
        in_specs=[
            pl.BlockSpec((1, Hot, 2 * W, Cout), lambda b, t: (b, t, 0, 0)),
            pl.BlockSpec((1, Cout), lambda b, t: (0, 0)),
            pl.BlockSpec((1, Cout), lambda b, t: (0, 0)),
        ],
        out_specs=pl.BlockSpec((1, Hot, 2 * W, Cout), lambda b, t: (b, t, 0, 0)),
        out_shape=jax.ShapeDtypeStruct((N, 2 * H, 2 * W, Cout), jnp.float32),
        compiler_params=cparams,
    )(conv_out, scale, shift)

    # back to NCHW
    return jnp.transpose(y, (0, 3, 1, 2))


if __name__ == "__main__":
    in_channels, out_channels = 8, 4
    N, H, W = 2, 8, 8  # from_up spatial; from_down is 2x spatial with out_channels

    key = jax.random.PRNGKey(0)
    kp, ku, kd = jax.random.split(key, 3)
    params = init_unet_up_block_params(kp, in_channels, out_channels)

    from_up = jax.random.normal(ku, (N, in_channels, H, W), jnp.float32)             # NCHW
    from_down = jax.random.normal(kd, (N, out_channels, 2 * H, 2 * W), jnp.float32)  # NCHW

    # row_tile_up=4 / row_tile_conv=8 -> 2 row tiles per batch element, exercising the halo
    # blocks and the cross-tile two-phase BatchNorm reduction.
    out = unet_up_block_forward(params, from_up, from_down,
                                row_tile_up=4, row_tile_conv=8)
    jax.block_until_ready(out)
    assert out.shape == (N, out_channels, 2 * H, 2 * W)
    print("KERNEL_OK")
</pallas_src>

<mosaic_0001>
module attributes {stable_mosaic.version = 11 : i64} {
  func.func @_upconv_kernel(%arg0: i32, %arg1: i32, %arg2: memref<1x4x10x8xf32, #tpu.memory_space<vmem>>, %arg3: memref<1x2x10x8xf32, #tpu.memory_space<vmem>>, %arg4: memref<4x32x4xf32, #tpu.memory_space<vmem>>, %arg5: memref<1x4xf32, #tpu.memory_space<vmem>>, %arg6: memref<1x4x2x8x2x4xf32, #tpu.memory_space<vmem>>) attributes {dimension_semantics = [#tpu.dimension_semantics<parallel>, #tpu.dimension_semantics<parallel>], iteration_bounds = array<i64: 2, 2>, scalar_prefetch = 0 : i64, scratch_operands = 0 : i64, tpu.core_type = #tpu.core_type<tc>, window_params = [{transform_indices = @transform_0, window_bounds = array<i64: 1, 4, 10, 8>}, {transform_indices = @transform_1, window_bounds = array<i64: 1, 2, 10, 8>}, {pipeline_mode = #tpu.pipeline_mode<synchronous>, transform_indices = @transform_2, window_bounds = array<i64: 4, 32, 4>}, {pipeline_mode = #tpu.pipeline_mode<synchronous>, transform_indices = @transform_3, window_bounds = array<i64: 1, 4>}, {transform_indices = @transform_4, window_bounds = array<i64: 1, 4, 2, 8, 2, 4>}]} {
    %c0 = arith.constant 0 : index
    %c0_0 = arith.constant 0 : index
    %c0_1 = arith.constant 0 : index
    %c0_2 = arith.constant 0 : index
    %0 = vector.load %arg2[%c0, %c0_0, %c0_1, %c0_2] : memref<1x4x10x8xf32, #tpu.memory_space<vmem>>, vector<1x4x10x8xf32>
    %c0_3 = arith.constant 0 : index
    %c0_4 = arith.constant 0 : index
    %c0_5 = arith.constant 0 : index
    %c0_6 = arith.constant 0 : index
    %1 = vector.load %arg3[%c0_3, %c0_4, %c0_5, %c0_6] : memref<1x2x10x8xf32, #tpu.memory_space<vmem>>, vector<1x2x10x8xf32>
    %2 = tpu.concatenate %0, %1 in 1 : vector<1x4x10x8xf32>, vector<1x2x10x8xf32> -> vector<1x6x10x8xf32>
    %3 = arith.truncf %2 : vector<1x6x10x8xf32> to vector<1x6x10x8xbf16>
    %c0_7 = arith.constant 0 : index
    %c0_8 = arith.constant 0 : index
    %c0_9 = arith.constant 0 : index
    %4 = vector.load %arg4[%c0_7, %c0_8, %c0_9] : memref<4x32x4xf32, #tpu.memory_space<vmem>>, vector<4x32x4xf32>
    %5 = arith.truncf %4 : vector<4x32x4xf32> to vector<4x32x4xbf16>
    %c0_10 = arith.constant 0 : index
    %c0_11 = arith.constant 0 : index
    %6 = vector.load %arg5[%c0_10, %c0_11] : memref<1x4xf32, #tpu.memory_space<vmem>>, vector<1x4xf32>
    %7 = vector.extract_strided_slice %3 {offsets = [0, 1, 1, 0], sizes = [1, 4, 8, 8], strides = [1, 1, 1, 1]} : vector<1x6x10x8xbf16> to vector<1x4x8x8xbf16>
    %8 = vector.extract_strided_slice %3 {offsets = [0, 1, 0, 0], sizes = [1, 4, 8, 8], strides = [1, 1, 1, 1]} : vector<1x6x10x8xbf16> to vector<1x4x8x8xbf16>
    %9 = vector.extract_strided_slice %3 {offsets = [0, 0, 1, 0], sizes = [1, 4, 8, 8], strides = [1, 1, 1, 1]} : vector<1x6x10x8xbf16> to vector<1x4x8x8xbf16>
    %10 = vector.extract_strided_slice %3 {offsets = [0, 0, 0, 0], sizes = [1, 4, 8, 8], strides = [1, 1, 1, 1]} : vector<1x6x10x8xbf16> to vector<1x4x8x8xbf16>
    %11 = tpu.concatenate %7, %8, %9, %10 in 3 : vector<1x4x8x8xbf16>, vector<1x4x8x8xbf16>, vector<1x4x8x8xbf16>, vector<1x4x8x8xbf16> -> vector<1x4x8x32xbf16>
    %12 = vector.shape_cast %11 : vector<1x4x8x32xbf16> to vector<32x32xbf16>
    %13 = vector.extract_strided_slice %5 {offsets = [0, 0, 0], sizes = [1, 32, 4], strides = [1, 1, 1]} : vector<4x32x4xbf16> to vector<1x32x4xbf16>
    %14 = vector.shape_cast %13 : vector<1x32x4xbf16> to vector<32x4xbf16>
    %cst = arith.constant dense<0.000000e+00> : vector<32x4xf32>
    %15 = tpu.matmul %12, %14, %cst {dimension_numbers = #tpu.dot_dimension_numbers<[1], [0], [0], [1], [0, 0, 1, 1], [], []>} : vector<32x32xbf16>, vector<32x4xbf16>, vector<32x4xf32> -> vector<32x4xf32>
    %16 = vector.broadcast %6 : vector<1x4xf32> to vector<32x4xf32>
    %17 = arith.addf %15, %16 : vector<32x4xf32>
    %18 = vector.shape_cast %17 : vector<32x4xf32> to vector<1x4x8x4xf32>
    %c0_12 = arith.constant 0 : index
    %c0_13 = arith.constant 0 : index
    %c0_14 = arith.constant 0 : index
    %c0_15 = arith.constant 0 : index
    %c0_16 = arith.constant 0 : index
    %c0_17 = arith.constant 0 : index
    %19 = vector.load %arg6[%c0_12, %c0_13, %c0_14, %c0_15, %c0_16, %c0_17] : memref<1x4x2x8x2x4xf32, #tpu.memory_space<vmem>>, vector<1x4x1x8x1x4xf32>
    %20 = vector.shape_cast %19 : vector<1x4x1x8x1x4xf32> to vector<1x4x8x4xf32>
    %21 = vector.shape_cast %18 : vector<1x4x8x4xf32> to vector<1x4x1x8x1x4xf32>
    tpu.vector_store %arg6[%c0_12, %c0_13, %c0_14, %c0_15, %c0_16, %c0_17], %21 {strides = array<i32>} : memref<1x4x2x8x2x4xf32, #tpu.memory_space<vmem>>, vector<1x4x1x8x1x4xf32>,
    %22 = vector.extract_strided_slice %3 {offsets = [0, 1, 2, 0], sizes = [1, 4, 8, 8], strides = [1, 1, 1, 1]} : vector<1x6x10x8xbf16> to vector<1x4x8x8xbf16>
    %23 = vector.extract_strided_slice %3 {offsets = [0, 1, 1, 0], sizes = [1, 4, 8, 8], strides = [1, 1, 1, 1]} : vector<1x6x10x8xbf16> to vector<1x4x8x8xbf16>
    %24 = vector.extract_strided_slice %3 {offsets = [0, 0, 2, 0], sizes = [1, 4, 8, 8], strides = [1, 1, 1, 1]} : vector<1x6x10x8xbf16> to vector<1x4x8x8xbf16>
    %25 = vector.extract_strided_slice %3 {offsets = [0, 0, 1, 0], sizes = [1, 4, 8, 8], strides = [1, 1, 1, 1]} : vector<1x6x10x8xbf16> to vector<1x4x8x8xbf16>
    %26 = tpu.concatenate %22, %23, %24, %25 in 3 : vector<1x4x8x8xbf16>, vector<1x4x8x8xbf16>, vector<1x4x8x8xbf16>, vector<1x4x8x8xbf16> -> vector<1x4x8x32xbf16>
    %27 = vector.shape_cast %26 : vector<1x4x8x32xbf16> to vector<32x32xbf16>
    %28 = vector.extract_strided_slice %5 {offsets = [1, 0, 0], sizes = [1, 32, 4], strides = [1, 1, 1]} : vector<4x32x4xbf16> to vector<1x32x4xbf16>
    %29 = vector.shape_cast %28 : vector<1x32x4xbf16> to vector<32x4xbf16>
    %cst_18 = arith.constant dense<0.000000e+00> : vector<32x4xf32>
    %30 = tpu.matmul %27, %29, %cst_18 {dimension_numbers = #tpu.dot_dimension_numbers<[1], [0], [0], [1], [0, 0, 1, 1], [], []>} : vector<32x32xbf16>, vector<32x4xbf16>, vector<32x4xf32> -> vector<32x4xf32>
    %31 = vector.broadcast %6 : vector<1x4xf32> to vector<32x4xf32>
    %32 = arith.addf %30, %31 : vector<32x4xf32>
    %33 = vector.shape_cast %32 : vector<32x4xf32> to vector<1x4x8x4xf32>
    %c0_19 = arith.constant 0 : index
    %c0_20 = arith.constant 0 : index
    %c0_21 = arith.constant 0 : index
    %c0_22 = arith.constant 0 : index
    %c1 = arith.constant 1 : index
    %c0_23 = arith.constant 0 : index
    %34 = vector.load %arg6[%c0_19, %c0_20, %c0_21, %c0_22, %c1, %c0_23] : memref<1x4x2x8x2x4xf32, #tpu.memory_space<vmem>>, vector<1x4x1x8x1x4xf32>
    %35 = vector.shape_cast %34 : vector<1x4x1x8x1x4xf32> to vector<1x4x8x4xf32>
    %36 = vector.shape_cast %33 : vector<1x4x8x4xf32> to vector<1x4x1x8x1x4xf32>
    tpu.vector_store %arg6[%c0_19, %c0_20, %c0_21, %c0_22, %c1, %c0_23], %36 {strides = array<i32>} : memref<1x4x2x8x2x4xf32, #tpu.memory_space<vmem>>, vector<1x4x1x8x1x4xf32>,
    %37 = vector.extract_strided_slice %3 {offsets = [0, 2, 1, 0], sizes = [1, 4, 8, 8], strides = [1, 1, 1, 1]} : vector<1x6x10x8xbf16> to vector<1x4x8x8xbf16>
    %38 = vector.extract_strided_slice %3 {offsets = [0, 2, 0, 0], sizes = [1, 4, 8, 8], strides = [1, 1, 1, 1]} : vector<1x6x10x8xbf16> to vector<1x4x8x8xbf16>
    %39 = vector.extract_strided_slice %3 {offsets = [0, 1, 1, 0], sizes = [1, 4, 8, 8], strides = [1, 1, 1, 1]} : vector<1x6x10x8xbf16> to vector<1x4x8x8xbf16>
    %40 = vector.extract_strided_slice %3 {offsets = [0, 1, 0, 0], sizes = [1, 4, 8, 8], strides = [1, 1, 1, 1]} : vector<1x6x10x8xbf16> to vector<1x4x8x8xbf16>
    %41 = tpu.concatenate %37, %38, %39, %40 in 3 : vector<1x4x8x8xbf16>, vector<1x4x8x8xbf16>, vector<1x4x8x8xbf16>, vector<1x4x8x8xbf16> -> vector<1x4x8x32xbf16>
    %42 = vector.shape_cast %41 : vector<1x4x8x32xbf16> to vector<32x32xbf16>
    %43 = vector.extract_strided_slice %5 {offsets = [2, 0, 0], sizes = [1, 32, 4], strides = [1, 1, 1]} : vector<4x32x4xbf16> to vector<1x32x4xbf16>
    %44 = vector.shape_cast %43 : vector<1x32x4xbf16> to vector<32x4xbf16>
    %cst_24 = arith.constant dense<0.000000e+00> : vector<32x4xf32>
    %45 = tpu.matmul %42, %44, %cst_24 {dimension_numbers = #tpu.dot_dimension_numbers<[1], [0], [0], [1], [0, 0, 1, 1], [], []>} : vector<32x32xbf16>, vector<32x4xbf16>, vector<32x4xf32> -> vector<32x4xf32>
    %46 = vector.broadcast %6 : vector<1x4xf32> to vector<32x4xf32>
    %47 = arith.addf %45, %46 : vector<32x4xf32>
    %48 = vector.shape_cast %47 : vector<32x4xf32> to vector<1x4x8x4xf32>
    %c0_25 = arith.constant 0 : index
    %c0_26 = arith.constant 0 : index
    %c1_27 = arith.constant 1 : index
    %c0_28 = arith.constant 0 : index
    %c0_29 = arith.constant 0 : index
    %c0_30 = arith.constant 0 : index
    %49 = vector.load %arg6[%c0_25, %c0_26, %c1_27, %c0_28, %c0_29, %c0_30] : memref<1x4x2x8x2x4xf32, #tpu.memory_space<vmem>>, vector<1x4x1x8x1x4xf32>
    %50 = vector.shape_cast %49 : vector<1x4x1x8x1x4xf32> to vector<1x4x8x4xf32>
    %51 = vector.shape_cast %48 : vector<1x4x8x4xf32> to vector<1x4x1x8x1x4xf32>
    tpu.vector_store %arg6[%c0_25, %c0_26, %c1_27, %c0_28, %c0_29, %c0_30], %51 {strides = array<i32>} : memref<1x4x2x8x2x4xf32, #tpu.memory_space<vmem>>, vector<1x4x1x8x1x4xf32>,
    %52 = vector.extract_strided_slice %3 {offsets = [0, 2, 2, 0], sizes = [1, 4, 8, 8], strides = [1, 1, 1, 1]} : vector<1x6x10x8xbf16> to vector<1x4x8x8xbf16>
    %53 = vector.extract_strided_slice %3 {offsets = [0, 2, 1, 0], sizes = [1, 4, 8, 8], strides = [1, 1, 1, 1]} : vector<1x6x10x8xbf16> to vector<1x4x8x8xbf16>
    %54 = vector.extract_strided_slice %3 {offsets = [0, 1, 2, 0], sizes = [1, 4, 8, 8], strides = [1, 1, 1, 1]} : vector<1x6x10x8xbf16> to vector<1x4x8x8xbf16>
    %55 = vector.extract_strided_slice %3 {offsets = [0, 1, 1, 0], sizes = [1, 4, 8, 8], strides = [1, 1, 1, 1]} : vector<1x6x10x8xbf16> to vector<1x4x8x8xbf16>
    %56 = tpu.concatenate %52, %53, %54, %55 in 3 : vector<1x4x8x8xbf16>, vector<1x4x8x8xbf16>, vector<1x4x8x8xbf16>, vector<1x4x8x8xbf16> -> vector<1x4x8x32xbf16>
    %57 = vector.shape_cast %56 : vector<1x4x8x32xbf16> to vector<32x32xbf16>
    %58 = vector.extract_strided_slice %5 {offsets = [3, 0, 0], sizes = [1, 32, 4], strides = [1, 1, 1]} : vector<4x32x4xbf16> to vector<1x32x4xbf16>
    %59 = vector.shape_cast %58 : vector<1x32x4xbf16> to vector<32x4xbf16>
    %cst_31 = arith.constant dense<0.000000e+00> : vector<32x4xf32>
    %60 = tpu.matmul %57, %59, %cst_31 {dimension_numbers = #tpu.dot_dimension_numbers<[1], [0], [0], [1], [0, 0, 1, 1], [], []>} : vector<32x32xbf16>, vector<32x4xbf16>, vector<32x4xf32> -> vector<32x4xf32>
    %61 = vector.broadcast %6 : vector<1x4xf32> to vector<32x4xf32>
    %62 = arith.addf %60, %61 : vector<32x4xf32>
    %63 = vector.shape_cast %62 : vector<32x4xf32> to vector<1x4x8x4xf32>
    %c0_32 = arith.constant 0 : index
    %c0_33 = arith.constant 0 : index
    %c1_34 = arith.constant 1 : index
    %c0_35 = arith.constant 0 : index
    %c1_36 = arith.constant 1 : index
    %c0_37 = arith.constant 0 : index
    %64 = vector.load %arg6[%c0_32, %c0_33, %c1_34, %c0_35, %c1_36, %c0_37] : memref<1x4x2x8x2x4xf32, #tpu.memory_space<vmem>>, vector<1x4x1x8x1x4xf32>
    %65 = vector.shape_cast %64 : vector<1x4x1x8x1x4xf32> to vector<1x4x8x4xf32>
    %66 = vector.shape_cast %63 : vector<1x4x8x4xf32> to vector<1x4x1x8x1x4xf32>
    tpu.vector_store %arg6[%c0_32, %c0_33, %c1_34, %c0_35, %c1_36, %c0_37], %66 {strides = array<i32>} : memref<1x4x2x8x2x4xf32, #tpu.memory_space<vmem>>, vector<1x4x1x8x1x4xf32>,
    return
  }
  func.func @transform_0(%arg0: i32, %arg1: i32) -> (i32, i32, i32, i32) {
    %c0_i32 = arith.constant 0 : i32
    %c0_i32_0 = arith.constant 0 : i32
    %c0_i32_1 = arith.constant 0 : i32
    return %arg0, %arg1, %c0_i32, %c0_i32_0 : i32, i32, i32, i32
  }
  func.func @transform_1(%arg0: i32, %arg1: i32) -> (i32, i32, i32, i32) {
    %c1_i32 = arith.constant 1 : i32
    %0 = arith.addi %arg1, %c1_i32 : i32
    %c2_i32 = arith.constant 2 : i32
    %1 = arith.muli %0, %c2_i32 : i32
    %c0_i32 = arith.constant 0 : i32
    %c0_i32_0 = arith.constant 0 : i32
    %c0_i32_1 = arith.constant 0 : i32
    return %arg0, %1, %c0_i32, %c0_i32_0 : i32, i32, i32, i32
  }
  func.func @transform_2(%arg0: i32, %arg1: i32) -> (i32, i32, i32) {
    %c0_i32 = arith.constant 0 : i32
    %c0_i32_0 = arith.constant 0 : i32
    %c0_i32_1 = arith.constant 0 : i32
    %c0_i32_2 = arith.constant 0 : i32
    return %c0_i32, %c0_i32_0, %c0_i32_1 : i32, i32, i32
  }
  func.func @transform_3(%arg0: i32, %arg1: i32) -> (i32, i32) {
    %c0_i32 = arith.constant 0 : i32
    %c0_i32_0 = arith.constant 0 : i32
    %c0_i32_1 = arith.constant 0 : i32
    return %c0_i32, %c0_i32_0 : i32, i32
  }
  func.func @transform_4(%arg0: i32, %arg1: i32) -> (i32, i32, i32, i32, i32, i32) {
    %c0_i32 = arith.constant 0 : i32
    %c0_i32_0 = arith.constant 0 : i32
    %c0_i32_1 = arith.constant 0 : i32
    %c0_i32_2 = arith.constant 0 : i32
    %c0_i32_3 = arith.constant 0 : i32
    return %arg0, %arg1, %c0_i32, %c0_i32_0, %c0_i32_1, %c0_i32_2 : i32, i32, i32, i32, i32, i32
  }
}

</mosaic_0001>

<bundles_post_ra>
// kernel: tpu_custom_call.1
= control target key start
LH: loop header
LB: loop body
LE: loop exit
PB: predicated region body
PF: predicated region fallthrough
CT: control target
= control target key end

     0   :  { %s1631_s15 = smov 0   ;;  %s1633_s16 = smov 0   ;;  %s2206_s0 = inlined_call_operand.vmem [shape: f32[2,10,10,8], index: 0, kind: input, shape index: {}]   ;;  %s2207_s1 = inlined_call_operand.vmem [shape: f32[2,10,10,8], index: 1, kind: input, shape index: {}]   ;;  %s2208_s2 = inlined_call_operand.vmem [shape: f32[4,32,4], index: 2, kind: input, shape index: {}]   ;;  %s2209_s3 = inlined_call_operand.vmem [shape: f32[1,4], index: 3, kind: input, shape index: {}]   ;;  %s2210_s4 = inlined_call_operand.vmem [shape: f32[2,8,2,8,2,4], index: 4, kind: output, shape index: {}]  }
   0x1   :  { %s1635_s17 = smov 0   ;;  %s1637_s18 = smov 0  }
   0x2   :  { %s1639_s19 = smov 0  }
   0x3 LB: > { %s23_s20 = sadd.s32 1, %s1593_s17  ;;  %s26_s21 = sadd.s32 1, %s1597_s18  ;;  %s1601_s19 = sphi %s1639_s19, %s14_s19   ;;  %s1597_s18 = sphi %s1637_s18, %s2219_s18   ;;  %s1593_s17 = sphi %s1635_s17, %s2218_s17   ;;  %s1589_s16 = sphi %s1633_s16, %s2217_s16   ;;  %s1585_s15 = sphi %s1631_s15, %s2216_s15  }
   0x4   : > { %p24_p0 = scmp.ge.s32.totalorder %s23_s20, 2  ;;  %p1418_p1 = scmp.ge.s32.totalorder %s1601_s19, 1 }
   0x5   : > { %p220_p2 = scmp.lt.s32.totalorder %s1601_s19, 5 }
   0x6   : > { %s2221_s20 = smov (%p24_p0, %s23_s20), 0  ;;  %s2223_s21 = smov (!%p24_p0, %s26_s21), %s1597_s18 }
   0x7   : > { %p221_p3 = pnand %p1418_p1, %p220_p2  ;;  %p28_p4 = scmp.ge.s32.totalorder %s2223_s21, 2 }
   0x8   : > { %s1661_s22 = sshll.u32 (!%p221_p3), %s1585_s15, 2  ;;  %p279_p5 = scmp.lt.s32.totalorder (!%p221_p3), %s1589_s16, 1 }
   0x9   : > { %s2225_s21 = smov (%p28_p4, %s2223_s21), 0  ;;  %224 = sbr.rel (%p221_p3) target bundleno = 440 (0x1b8), region = 36 }
   0xa   : > { %p281_p6 = scmp.lt.s32.totalorder (!%p221_p3), %s1661_s22, 9  ;;  %p312_p7 = scmp.lt.s32.totalorder (!%p221_p3), %s1661_s22, 7 }
   0xb   : > { %s1517_s6 = sadd.s32 (!%p221_p3), 4, %s1661_s22  ;;  %s1603_s10 = smov (!%p221_p3), 16  }
   0xc   : > { %p1685_p8 = scmp.lt.s32.totalorder (!%p221_p3), %s1517_s6, 9  ;;  %s1604_s13 = smov (!%p221_p3), 8  }
   0xd   : > { %s1605_s14 = smov (!%p221_p3), 24  }
   0xe   : > { %s2227_s16 = smov (!%p279_p5, %s1589_s16), 1  ;;  %s2231_s6 = smov (!%p1685_p8, %s1517_s6), 9  ;;  %vm467_vm0 = vcmask 64512   ;;  %vm480_vm1 = vcmask 130048   ;;  %vm489_vm2 = vcmask 195584   ;;  %vm598_vm6 = vcmask 261120  }
   0xf   : > { %s282_s23 = scalar_select %p281_p6, %s1661_s22, 9  ;;  %vm518_vm3 = vsmask.f32 3328  ;;  %vm519_vm4 = vsmask.f32 7440  ;;  %vm804_vm7 = vcmask 1042432  }
  0x10   : > { %s1518_s24 = smul.u32 20, %s2227_s16  ;;  %s1428_s28 = sshll.u32 %s2227_s16, 7  ;;  %vm1827_vm5 = vmor %vm518_vm3, %vm519_vm4  ;;  %vm805_vm8 = vcmask 1046532   ;;  %vm684_vm10 = vcmask 24576  }
  0x11   : > { %s1420_s25 = sshll.u32 %s282_s23, 1  ;;  %s2229_s22 = smov (!%p312_p7, %s1661_s22), 7  ;;  %vm1853_vm9 = vmor %vm804_vm7, %vm805_vm8 }
  0x12   : > { %s285_s26 = sadd.s32 %s1518_s24, %s1420_s25  ;;  %s1427_s7 = sshll.u32 %s2229_s22, 4 }
  0x13   : > { %s1421_s27 = sshll.u32 %s285_s26, 3  ;;  %s1689_s9 = sadd.s32 %s1428_s28, %s1427_s7 }
  0x14   : > { %s1675_s5 = scalar_lea.vmem %s2206_s0, %s1421_s27  ;;  %s1424_s11 = sshll.u32 %s2231_s6, 1 }
  0x15   : > { %v323_v0 = vld [vmem:[%s1675_s5 + $0x10] sm:$0xff]  ;;  %v324_v1 = vld [vmem:[%s1675_s5 + $0x18] sm:$0x3]  ;;  %v325_v2 = vld [vmem:[%s1675_s5 + $0x20] sm:$0xff]  ;;  %s303_s12 = sadd.s32 %s1518_s24, %s1424_s11  ;;  %s1429_s11 = sshll.u32 %s1689_s9, 1 }
  0x16   : > { %v335_v3 = vpack.c.bf16 %v323_v0, %v323_v0  ;;  %v336_v4 = vpack.c.bf16 %v324_v1, %v324_v1  ;;  %v326_v5 = vld [vmem:[%s1675_s5 + $0x28] sm:$0x3]  ;;  %v337_v6 = vpack.c.bf16 %v325_v2, %v325_v2  ;;  %v327_v7 = vld [vmem:[%s1675_s5 + $0x30] sm:$0xff]  ;;  %v328_v8 = vld [vmem:[%s1675_s5 + $0x38] sm:$0x3]  ;;  %s1425_s15 = sshll.u32 %s303_s12, 3  ;;  %s1917_s16 = scalar_lea.vmem %s2210_s4, %s1429_s11 }
  0x17   : > { %v338_v9 = vpack.c.bf16 %v326_v5, %v326_v5  ;;  %v339_v10 = vpack.c.bf16 %v327_v7, %v327_v7  ;;  %v321_v14 = vld [vmem:[%s1675_s5] sm:$0xff]  ;;  %v340_v15 = vpack.c.bf16 %v328_v8, %v328_v8  ;;  %s1714_s23 = scalar_lea.vmem %s2207_s1, %s1425_s15  ;;  %v322_v46 = vld [vmem:[%s1675_s5 + $0x8] sm:$0x3] }
  0x18   : > { %v386_v11 = vunpack.c.l.b16 %v335_v3  ;;  %v387_v12 = vunpack.c.l.b16 %v336_v4  ;;  %v388_v13 = vunpack.c.l.b16 %v337_v6  ;;  %v333_v22 = vpack.c.bf16 %v321_v14, %v321_v14  ;;  %v331_v47 = vld [vmem:[%s1714_s23 + $0x10] sm:$0xff]  ;;  %v329_v55 = vld [vmem:[%s1714_s23] sm:$0xff]  ;;  %v332_v5 = vld [vmem:[%s1714_s23 + $0x18] sm:$0x3] }
  0x19   : > { %v390_v16 = vunpack.c.l.b16 %v339_v10  ;;  %v389_v18 = vunpack.c.l.b16 %v338_v9  ;;  %v391_v27 = vunpack.c.l.b16 %v340_v15  ;;  %v334_v52 = vpack.c.bf16 %v322_v46, %v322_v46 }
  0x1a   : > { %v1692_v17 = vpack.c.b16 %v387_v12, %v386_v11  ;;  %v399_v19 = vpack.c.b16 %v388_v13, %v388_v13  ;;  %v398_v20 = vpack.c.b16 %v386_v11, %v386_v11  ;;  %v440_v35 = vunpack.c.l.b16 %v333_v22 }
  0x1b   : > { %v400_v21 = vpack.c.b16 %v390_v16, %v390_v16  ;;  %v1698_v29 = vpack.c.b16 %v389_v18, %v388_v13  ;;  %v1704_v36 = vpack.c.b16 %v391_v27, %v390_v16  ;;  %v343_v53 = vpack.c.bf16 %v331_v47, %v331_v47  ;;  %v330_v16 = vld [vmem:[%s1714_s23 + $0x8] sm:$0x3] }
  0x1c   : > { %445 = vrot.lane.b32.xlu1 %v1692_v17, %s1603_s10  ;;  %v410_v23 = vshrl.u32 %v399_v19, 16  ;;  %v413_v24 = vshll.u32 %v399_v19, 16  ;;  %v403_v25 = vshrl.u32 %v398_v20, 16  ;;  %v406_v26 = vshll.u32 %v398_v20, 16 }
  0x1d   : > { %v417_v30 = vshrl.u32 %v400_v21, 16  ;;  %v723_v33 = vshrl.u32 %v1698_v29, 16  ;;  %v420_v38 = vshll.u32 %v400_v21, 16  ;;  %v726_v40 = vshll.u32 %v1698_v29, 16 }
  0x1e   : > { %v412_v28 = vrot.slane %v410_v23, 7  ;;  %v405_v31 = vrot.slane %v403_v25, 7  ;;  %v451_v41 = vpack.c.b16 %v440_v35, %v440_v35  ;;  %v729_v43 = vshrl.u32 %v1704_v36, 16 }
  0x1f   : > { %v419_v37 = vrot.slane %v417_v30, 7  ;;  %v725_v39 = vrot.slane %v723_v33, 7  ;;  %v732_v49 = vshll.u32 %v1704_v36, 16  ;;  %v441_v57 = vunpack.c.l.b16 %v334_v52  ;;  %v351_v52 = vld [vmem:[%s2208_s2 + $0x30] sm:$0xff] }
  0x20   : > { %v415_v32 = vor.u32 %v413_v24, %v412_v28  ;;  %v408_v34 = vor.u32 %v406_v26, %v405_v31  ;;  %v453_v45 = vshrl.u32 %v451_v41, 16  ;;  %v731_v48 = vrot.slane %v729_v43, 7  ;;  %v354_v43 = vld [vmem:[%s2208_s2 + $0x48] sm:$0xff] }
  0x21   : > { %v422_v42 = vor.u32 %v420_v38, %v419_v37  ;;  %v728_v44 = vor.u32 %v726_v40, %v725_v39  ;;  %v456_v51 = vshll.u32 %v451_v41, 16  ;;  %v717_v58 = vshrl.u32 %v1692_v17, 16  ;;  %v356_v37 = vld [vmem:[%s2208_s2 + $0x58] sm:$0xff] }
  0x22   : > { %432 = vrot.lane.b32.xlu0 %v415_v32, %s1604_s13  ;;  %461 = vrot.lane.b32.xlu2 %v408_v34, %s1605_s14  ;;  %v455_v50 = vrot.slane %v453_v45, 7  ;;  %v734_v54 = vor.u32 %v732_v49, %v731_v48  ;;  %v960_v59 = vunpack.c.l.b16 %v343_v53  ;;  %v341_v60 = vpack.c.bf16 %v329_v55, %v329_v55  ;;  %v352_v53 = vld [vmem:[%s2208_s2 + $0x38] sm:$0xff] }
  0x23   : > { %v442_v61 = vpack.c.b16 %v441_v57, %v440_v35  ;;  %v719_v62 = vrot.slane %v717_v58, 7  ;;  %v720_v63 = vshll.u32 %v1692_v17, 16  ;;  %v344_v9 = vpack.c.bf16 %v332_v5, %v332_v5  ;;  %v355_v35 = vld [vmem:[%s2208_s2 + $0x50] sm:$0xff] }
  0x24   : > { %447 = vrot.lane.b32.xlu1 %v1698_v29, %s1603_s10  ;;  %v458_v56 = vor.u32 %v456_v51, %v455_v50  ;;  %v963_v0 = vpack.c.b16 %v960_v59, %v960_v59  ;;  %v392_v1 = vunpack.c.l.b16 %v341_v60  ;;  %v342_v21 = vpack.c.bf16 %v330_v16, %v330_v16  ;;  %v348_v60 = vld [vmem:[%s2208_s2 + $0x18] sm:$0xff]  ;;  %v345_v16 = vld [vmem:[%s2208_s2] sm:$0xff] }
  0x25   : > { %v750_v2 = vshrl.u32 %v442_v61, 16  ;;  %v722_v3 = vor.u32 %v720_v63, %v719_v62  ;;  %v753_v8 = vshll.u32 %v442_v61, 16  ;;  %v961_v14 = vunpack.c.l.b16 %v344_v9 }
  0x26   : > { %v965_v4 = vshrl.u32 %v963_v0, 16  ;;  %v401_v6 = vpack.c.b16 %v392_v1, %v392_v1  ;;  %v968_v11 = vshll.u32 %v963_v0, 16  ;;  %v393_v23 = vunpack.c.l.b16 %v342_v21  ;;  %v349_v0 = vld [vmem:[%s2208_s2 + $0x20] sm:$0xff] }
  0x27   : > { %v752_v7 = vrot.slane %v750_v2, 7  ;;  %v1735_v20 = vpack.c.b16 %v961_v14, %v960_v59  ;;  %v371_v38 = vpack.c.bf16 %v355_v35, %v355_v35  ;;  %v372_v39 = vpack.c.bf16 %v356_v37, %v356_v37  ;;  %v347_v59 = vld [vmem:[%s2208_s2 + $0x10] sm:$0xff] }
  0x28   : > { %v967_v10 = vrot.slane %v965_v4, 7  ;;  %v424_v12 = vshrl.u32 %v401_v6, 16  ;;  %v427_v19 = vshll.u32 %v401_v6, 16  ;;  %v1743_v25 = vpack.c.b16 %v393_v23, %v392_v1  ;;  %v350_v1 = vld [vmem:[%s2208_s2 + $0x28] sm:$0xff] }
  0x29   : > { %v755_v13 = vor.u32 %v753_v8, %v752_v7  ;;  %v1136_v24 = vshrl.u32 %v1735_v20, 16  ;;  %v1139_v27 = vshll.u32 %v1735_v20, 16  ;;  %v1012_v40 = vunpack.c.l.b16 %v371_v38  ;;  %v359_v7 = vld [vmem:[%s2208_s2 + $0x70] sm:$0xff]  ;;  %v360_v8 = vld [vmem:[%s2208_s2 + $0x78] sm:$0xff] }
  0x2a   : > { %434 = vrot.lane.b32.xlu0 %v422_v42, %s1604_s13  ;;  %463 = vrot.lane.b32.xlu2 %v415_v32, %s1605_s14  ;;  %v970_v15 = vor.u32 %v968_v11, %v967_v10  ;;  %v426_v18 = vrot.slane %v424_v12, 7  ;;  %v735_v28 = vshrl.u32 %v1743_v25, 16  ;;  %v738_v32 = vshll.u32 %v1743_v25, 16 }
  0x2b   : > { %v1138_v26 = vrot.slane %v1136_v24, 7  ;;  %v1013_v41 = vunpack.c.l.b16 %v372_v39  ;;  %v370_v46 = vpack.c.bf16 %v354_v43, %v354_v43  ;;  %v368_v55 = vpack.c.bf16 %v352_v53, %v352_v53  ;;  %v357_v24 = vld [vmem:[%s2208_s2 + $0x60] sm:$0xff] }
  0x2c   : > { %743 = vrot.lane.b32.xlu1 %v728_v44, %s1604_s13  ;;  %v429_v22 = vor.u32 %v427_v19, %v426_v18  ;;  %v737_v31 = vrot.slane %v735_v28, 7  ;;  %v363_v62 = vpack.c.bf16 %v347_v59, %v347_v59  ;;  %v364_v63 = vpack.c.bf16 %v348_v60, %v348_v60  ;;  %v346_v18 = vld [vmem:[%s2208_s2 + $0x8] sm:$0xff] }
  0x2d   : > { %v1141_v30 = vor.u32 %v1139_v27, %v1138_v26  ;;  %v1011_v48 = vunpack.c.l.b16 %v370_v46  ;;  %v836_v58 = vunpack.c.l.b16 %v368_v55  ;;  %v365_v5 = vpack.c.bf16 %v349_v0, %v349_v0 }
  0x2e   : > { %v740_v33 = vor.u32 %v738_v32, %v737_v31  ;;  %v366_v6 = vpack.c.bf16 %v350_v1, %v350_v1  ;;  %v592_v10 = vunpack.c.l.b16 %v363_v62  ;;  %v593_v11 = vunpack.c.l.b16 %v364_v63 }
  0x2f   : > { %v833_v14 = vunpack.c.l.b16 %v365_v5  ;;  %v375_v21 = vpack.c.bf16 %v359_v7, %v359_v7  ;;  %v361_v23 = vpack.c.bf16 %v345_v16, %v345_v16  ;;  %v362_v28 = vpack.c.bf16 %v346_v18, %v346_v18 }
  0x30   : > { %v595_v19 = vpack.c.b16 %v593_v11, %v592_v10 }
  0x31   : > { %v1169_v31 = vunpack.c.l.b16 %v375_v21 }
  0x32   : > { %430 = vrot.lane.b32.xlu0 %v408_v34, %s1604_s13  ;;  %745 = vrot.lane.b32.xlu2 %v734_v54, %s1604_s13 }
  0x33   : > { %611 = vmatpush.bf16.msra.mxu0 %v595_v19 }
  0x34   : > { %459 = vrot.lane.b32.xlu1 %v458_v56, %s1605_s14 }
  0x3a   : > { %443 = vrot.lane.b32.xlu0 %v442_v61, %s1603_s10  ;;  %758 = vrot.lane.b32.xlu2 %v722_v3, %s1605_s14 }
  0x3c   : > { %741 = vrot.lane.b32.xlu1 %v722_v3, %s1604_s13 }
  0x42   : > { %760 = vrot.lane.b32.xlu0 %v728_v44, %s1605_s14  ;;  %756 = vrot.lane.b32.xlu2 %v755_v13, %s1605_s14  ;;  %v1015_v44 = vpack.c.b16 %v1013_v41, %v1012_v40  ;;  %v591_v40 = vunpack.c.l.b16 %v362_v28 }
  0x44   : > { %971 = vrot.lane.b32.xlu1 %v970_v15, %s1604_s13  ;;  %1030 = vmatpush.bf16.msra.mxu2 %v1015_v44  ;;  %v834_v15 = vunpack.c.l.b16 %v366_v6 }
  0x46   : > { %v837_v27 = vpack.c.b16 %v834_v15, %v833_v14 }
  0x4a   : > { %436 = vrot.lane.b32.xlu0 %v429_v22, %s1604_s13  ;;  %449 = vrot.lane.b32.xlu2 %v1704_v36, %s1603_s10 }
  0x4c   : > { %465 = vrot.lane.b32.xlu1 %v422_v42, %s1605_s14  ;;  %v353_v42 = vld [vmem:[%s2208_s2 + $0x40] sm:$0xff] }
  0x4d   : > { %v369_v45 = vpack.c.bf16 %v353_v42, %v353_v42 }
  0x4f   : > { %v1010_v47 = vunpack.c.l.b16 %v369_v45 }
  0x51   : > { %v1014_v49 = vpack.c.b16 %v1011_v48, %v1010_v47 }
  0x52   : > { %973 = vrot.lane.b32.xlu0 %v1743_v25, %s1603_s10  ;;  %975 = vrot.lane.b32.xlu2 %v429_v22, %s1605_s14  ;;  %v376_v22 = vpack.c.bf16 %v360_v8, %v360_v8 }
  0x53   : > { %1031 = vmatpush.bf16.msra.mxu2 %v1014_v49 }
  0x54   : > { %1142 = vrot.lane.b32.xlu1 %v1141_v30, %s1604_s13  ;;  %v358_v30 = vld [vmem:[%s2208_s2 + $0x68] sm:$0xff]  ;;  %v1170_v32 = vunpack.c.l.b16 %v376_v22 }
  0x55   : > { %v374_v43 = vpack.c.bf16 %v358_v30, %v358_v30 }
  0x56   : > { %v1172_v42 = vpack.c.b16 %v1170_v32, %v1169_v31 }
  0x58   : > { %1187 = vmatpush.bf16.msra.mxu3 %v1172_v42 }
  0x5a   : > { %747 = vrot.lane.b32.xlu0 %v740_v33, %s1604_s13  ;;  %762 = vrot.lane.b32.xlu2 %v734_v54, %s1605_s14  ;;  %v367_v54 = vpack.c.bf16 %v351_v52, %v351_v52 }
  0x5c   : > { %v835_v57 = vunpack.c.l.b16 %v367_v54  ;;  %v1168_v54 = vunpack.c.l.b16 %v374_v43 }
  0x5e   : > { %v838_v4 = vpack.c.b16 %v836_v58, %v835_v57 }
  0x60   : > { %853 = vmatpush.bf16.msra.mxu1 %v838_v4 }
  0x62   : > { %1144 = vrot.lane.b32.xlu0 %v740_v33, %s1605_s14  ;;  %v590_v33 = vunpack.c.l.b16 %v361_v23 }
  0x64   : > { %854 = vmatpush.bf16.msra.mxu1 %v837_v27  ;;  %v594_v53 = vpack.c.b16 %v591_v40, %v590_v33 }
  0x66   : > { %612 = vmatpush.bf16.msra.mxu0 %v594_v53 }
  0x7c   : > { %v462_v34 = vpop.permute.xlu2 %461 }
  0x84   : > { %v1769_v51 = vpop.permute.xlu2 %463 }
  0x8c   : > { %v1802_v13 = vpop.permute.xlu2 %745 }
  0x8d   : > { %v769_v40 = vsel %vm467_vm0, %v1704_v36, %v1802_v13 }
  0x8e   : > { %v1767_v50 = vpop.permute.xlu1 %445 }
  0x94   : > { %v433_v56 = vpop.permute.xlu0 %432  ;;  %v759_v62 = vpop.permute.xlu2 %758 }
  0x95   : > { %v473_v61 = vsel %vm467_vm0, %v1698_v29, %v433_v56 }
  0x96   : > { %v484_v2 = vsel %vm480_vm1, %v473_v61, %v1767_v50  ;;  %v1793_v3 = vpop.permute.xlu1 %447 }
  0x97   : > { %v493_v9 = vsel %vm489_vm2, %v484_v2, %v462_v34  ;;  %v373_v34 = vpack.c.bf16 %v357_v24, %v357_v24 }
  0x98   : > { %v504_v12 = vunpack.c.l.b16 %v493_v9  ;;  %v505_v35 = vunpack.c.h.b16 %v493_v9 }
  0x99   : > { %v1167_v44 = vunpack.c.l.b16 %v373_v34 }
  0x9a   : > { %v512_v26 = vpack.c.b16 %v504_v12, %v504_v12  ;;  %v513_v55 = vpack.c.b16 %v505_v35, %v505_v35 }
  0x9b   : > { %v1171_v58 = vpack.c.b16 %v1168_v54, %v1167_v44 }
  0x9c   : > { %v536_v37 = vshrl.u32 %v512_v26, 16  ;;  %v539_v38 = vshll.u32 %v512_v26, 16  ;;  %v435_v39 = vpop.permute.xlu0 %434  ;;  %v757_v31 = vpop.permute.xlu2 %756 }
  0x9d   : > { %v476_v41 = vsel %vm467_vm0, %v1704_v36, %v435_v39  ;;  %1188 = vmatpush.bf16.msra.mxu3 %v1171_v58 }
  0x9e   : > { %v538_v45 = vrot.slane %v536_v37, 4  ;;  %v541_v46 = vrot.slane %v539_v38, 5  ;;  %v486_v47 = vsel %vm480_vm1, %v476_v41, %v1793_v3  ;;  %v744_v48 = vpop.permute.xlu1 %743 }
  0x9f   : > { %v495_v49 = vsel %vm489_vm2, %v486_v47, %v1769_v51  ;;  %v767_v52 = vsel %vm467_vm0, %v1698_v29, %v744_v48  ;;  %v545_v51 = vshll.u32 %v513_v55, 16 }
  0xa0   : > { %v506_v56 = vunpack.c.l.b16 %v495_v49  ;;  %v507_v57 = vunpack.c.h.b16 %v495_v49  ;;  %v773_v61 = vsel %vm480_vm1, %v767_v52, %v1767_v50  ;;  %v542_v63 = vor.u32 %v541_v46, %v538_v45 }
  0xa1   : > { %v779_v2 = vsel %vm489_vm2, %v773_v61, %v759_v62  ;;  %v547_v50 = vrot.slane %v545_v51, 5  ;;  %v774_v52 = vsel %vm480_vm1, %v769_v40, %v1793_v3 }
  0xa2   : > { %v514_v59 = vpack.c.b16 %v506_v56, %v506_v56  ;;  %v515_v60 = vpack.c.b16 %v507_v57, %v507_v57  ;;  %v543_v8 = vrot.slane %v542_v63, 4  ;;  %v790_v10 = vunpack.c.l.b16 %v779_v2 }
  0xa3   : > { %v791_v11 = vunpack.c.h.b16 %v779_v2 }
  0xa4   : > { %v550_v0 = vshrl.u32 %v514_v59, 16  ;;  %v553_v29 = vshll.u32 %v514_v59, 16  ;;  %v431_v1 = vpop.permute.xlu0 %430  ;;  %v559_v6 = vshll.u32 %v515_v60, 16  ;;  %v548_v15 = vsel %vm1827_vm5, %v543_v8, %v547_v50 }
  0xa5   : > { %v798_v18 = vpack.c.b16 %v790_v10, %v790_v10  ;;  %v799_v19 = vpack.c.b16 %v791_v11, %v791_v11  ;;  %v470_v21 = vsel %vm467_vm0, %v1692_v17, %v431_v1  ;;  %v1838_v26 = vunpack.c.l.b16 %v548_v15 }
  0xa6   : > { %v552_v4 = vrot.slane %v550_v0, 4  ;;  %v555_v5 = vrot.slane %v553_v29, 5  ;;  %v460_v7 = vpop.permute.xlu1 %459  ;;  %v561_v14 = vrot.slane %v559_v6, 5  ;;  %v450_v0 = vpop.permute.xlu2 %449 }
  0xa7   : > { %v1433_v37 = vrot.slane %v798_v18, 9  ;;  %v813_v38 = vrot.slane %v799_v19, 5 }
  0xa8   : > { %v556_v12 = vor.u32 %v555_v5, %v552_v4 }
  0xa9   : > { %v814_v13 = vsel %vm1853_vm9, %v1433_v37, %v813_v38 }
  0xaa   : > { %v557_v16 = vrot.slane %v556_v12, 4  ;;  %v824_v4 = vunpack.c.l.b16 %v814_v13 }
  0xac   : > { %v444_v22 = vpop.permute.xlu0 %443  ;;  %v562_v23 = vsel %vm1827_vm5, %v557_v16, %v561_v14 }
  0xad   : > { %v482_v24 = vsel %vm480_vm1, %v470_v21, %v444_v22  ;;  %v1840_v27 = vunpack.c.l.b16 %v562_v23 }
  0xae   : > { %v491_v28 = vsel %vm489_vm2, %v482_v24, %v460_v7  ;;  %v742_v30 = vpop.permute.xlu1 %741 }
  0xaf   : > { %v502_v32 = vunpack.c.l.b16 %v491_v28  ;;  %v503_v33 = vunpack.c.h.b16 %v491_v28  ;;  %v765_v34 = vsel %vm467_vm0, %v1692_v17, %v742_v30  ;;  %v1004_v35 = vpack.c.b16 %v1840_v27, %v1838_v26 }
  0xb0   : > { %v772_v39 = vsel %vm480_vm1, %v765_v34, %v444_v22 }
  0xb1   : > { %v510_v41 = vpack.c.b16 %v502_v32, %v502_v32  ;;  %v511_v42 = vpack.c.b16 %v503_v33, %v503_v33  ;;  %v777_v43 = vsel %vm489_vm2, %v772_v39, %v757_v31  ;;  %1438 = vmatmul.msk.bf16.vlgmr.msra.gmra.mxu2 %vm598_vm6, %v1004_v35  ;;  %v976_v31 = vpop.permute.xlu2 %975 }
  0xb2   : > { %v788_v17 = vunpack.c.l.b16 %v777_v43  ;;  %v789_v45 = vunpack.c.h.b16 %v777_v43 }
  0xb3   : > { %v522_v46 = vshrl.u32 %v510_v41, 16  ;;  %v525_v47 = vshll.u32 %v510_v41, 16  ;;  %v531_v55 = vshll.u32 %v511_v42, 16 }
  0xb4   : > { %v796_v48 = vpack.c.b16 %v788_v17, %v788_v17  ;;  %v797_v49 = vpack.c.b16 %v789_v45, %v789_v45  ;;  %v761_v36 = vpop.permute.xlu0 %760 }
  0xb5   : > { %v524_v53 = vrot.slane %v522_v46, 4  ;;  %v527_v54 = vrot.slane %v525_v47, 5  ;;  %v781_v56 = vsel %vm489_vm2, %v774_v52, %v761_v36  ;;  %v533_v1 = vrot.slane %v531_v55, 5 }
  0xb6   : > { %v1432_v57 = vrot.slane %v796_v48, 9  ;;  %v809_v58 = vrot.slane %v797_v49, 5  ;;  %v792_v59 = vunpack.c.l.b16 %v781_v56  ;;  %v793_v60 = vunpack.c.h.b16 %v781_v56  ;;  %v972_v61 = vpop.permute.xlu1 %971 }
  0xb7   : > { %v528_v62 = vor.u32 %v527_v54, %v524_v53  ;;  %v979_v24 = vsel %vm467_vm0, %v1735_v20, %v972_v61 }
  0xb8   : > { %v800_v63 = vpack.c.b16 %v792_v59, %v792_v59  ;;  %v801_v51 = vpack.c.b16 %v793_v60, %v793_v60  ;;  %v810_v3 = vsel %vm1853_vm9, %v1432_v57, %v809_v58 }
  0xb9   : > { %v529_v29 = vrot.slane %v528_v62, 4  ;;  %v823_v2 = vunpack.c.l.b16 %v810_v3  ;;  %v763_v52 = vpop.permute.xlu2 %762 }
  0xba   : > { %v1434_v5 = vrot.slane %v800_v63, 9  ;;  %v817_v6 = vrot.slane %v801_v51, 5 }
  0xbb   : > { %v827_v7 = vpack.c.b16 %v824_v4, %v823_v2  ;;  %v534_v8 = vsel %vm1827_vm5, %v529_v29, %v533_v1 }
  0xbc   : > { %v437_v50 = vpop.permute.xlu0 %436  ;;  %v580_v10 = vunpack.c.l.b16 %v534_v8  ;;  %v1868_v11 = vsel %vm1853_vm9, %v1434_v5, %v817_v6 }
  0xbd   : > { %v479_v12 = vsel %vm467_vm0, %v1743_v25, %v437_v50  ;;  %1436 = vmatmul.msk.bf16.vlgmr.msra.gmra.mxu1 %vm598_vm6, %v827_v7  ;;  %v825_v14 = vunpack.c.l.b16 %v1868_v11 }
  0xbe   : > { %v488_v15 = vsel %vm480_vm1, %v479_v12, %v450_v0  ;;  %v466_v16 = vpop.permute.xlu1 %465  ;;  %v584_v18 = vpack.c.b16 %v1838_v26, %v580_v10 }
  0xbf   : > { %v497_v19 = vsel %vm489_vm2, %v488_v15, %v466_v16  ;;  %v1161_v21 = vpack.c.b16 %v825_v14, %v824_v4 }
  0xc0   : > { %v508_v22 = vunpack.c.l.b16 %v497_v19  ;;  %v509_v23 = vunpack.c.h.b16 %v497_v19  ;;  %1430 = vmatmul.msk.bf16.vlgmr.msra.gmra.mxu0 %vm598_vm6, %v584_v18 }
  0xc1   : > { %1473 = vmatmul.msk.bf16.vlgmr.msra.gmra.mxu3 %vm598_vm6, %v1161_v21 }
  0xc2   : > { %v516_v28 = vpack.c.b16 %v508_v22, %v508_v22  ;;  %v517_v30 = vpack.c.b16 %v509_v23, %v509_v23 }
  0xc4   : > { %v564_v32 = vshrl.u32 %v516_v28, 16  ;;  %v567_v33 = vshll.u32 %v516_v28, 16  ;;  %v974_v26 = vpop.permute.xlu0 %973  ;;  %v573_v38 = vshll.u32 %v517_v30, 16 }
  0xc5   : > { %v981_v34 = vsel %vm480_vm1, %v979_v24, %v974_v26  ;;  %v1912_v24 = vld [vmem:[%s2209_s3] ss:$0 sm:$0xff] }
  0xc6   : > { %v566_v35 = vrot.slane %v564_v32, 4  ;;  %v569_v37 = vrot.slane %v567_v33, 5  ;;  %v983_v39 = vsel %vm489_vm2, %v981_v34, %v976_v31  ;;  %v575_v46 = vrot.slane %v573_v38, 5  ;;  %v1143_v56 = vpop.permute.xlu1 %1142 }
  0xc7   : > { %v985_v40 = vunpack.c.l.b16 %v983_v39  ;;  %v986_v41 = vunpack.c.h.b16 %v983_v39  ;;  %v1147_v29 = vsel %vm467_vm0, %v1735_v20, %v1143_v56 }
  0xc8   : > { %v570_v42 = vor.u32 %v569_v37, %v566_v35  ;;  %v1148_v5 = vsel %vm480_vm1, %v1147_v29, %v974_v26 }
  0xc9   : > { %v987_v43 = vpack.c.b16 %v985_v40, %v985_v40  ;;  %v988_v17 = vpack.c.b16 %v986_v41, %v986_v41 }
  0xca   : > { %v571_v45 = vrot.slane %v570_v42, 4 }
  0xcb   : > { %v990_v47 = vshrl.u32 %v987_v43, 16  ;;  %v993_v48 = vshll.u32 %v987_v43, 16  ;;  %v999_v54 = vshll.u32 %v988_v17, 16 }
  0xcc   : > { %v748_v49 = vpop.permute.xlu0 %747  ;;  %v576_v36 = vsel %vm1827_vm5, %v571_v45, %v575_v46 }
  0xcd   : > { %v992_v13 = vrot.slane %v990_v47, 4  ;;  %v995_v53 = vrot.slane %v993_v48, 5  ;;  %v771_v55 = vsel %vm467_vm0, %v1743_v25, %v748_v49  ;;  %v583_v58 = vunpack.c.l.b16 %v576_v36 }
  0xce   : > { %v775_v57 = vsel %vm480_vm1, %v771_v55, %v450_v0  ;;  %v1001_v3 = vrot.slane %v999_v54, 5 }
  0xcf   : > { %v996_v59 = vor.u32 %v995_v53, %v992_v13  ;;  %v783_v60 = vsel %vm489_vm2, %v775_v57, %v763_v52  ;;  %v585_v63 = vpack.c.b16 %v583_v58, %v1840_v27 }
  0xd0   : > { %v794_v61 = vunpack.c.l.b16 %v783_v60  ;;  %v795_v62 = vunpack.c.h.b16 %v783_v60 }
  0xd1   : > { %v997_v51 = vrot.slane %v996_v59, 4  ;;  %1431 = vmatmul.msk.bf16.gmra.mxu0 %vm598_vm6, %v585_v63 }
  0xd2   : > { %v802_v1 = vpack.c.b16 %v794_v61, %v794_v61  ;;  %v803_v2 = vpack.c.b16 %v795_v62, %v795_v62 }
  0xd3   : > { %v1002_v25 = vsel %vm1827_vm5, %v997_v51, %v1001_v3 }
  0xd4   : > { %v1435_v0 = vrot.slane %v802_v1, 9  ;;  %v821_v4 = vrot.slane %v803_v2, 5  ;;  %v1145_v6 = vpop.permute.xlu0 %1144  ;;  %v1003_v7 = vunpack.c.l.b16 %v1002_v25 }
  0xd5   : > { %v1150_v27 = vsel %vm489_vm2, %v1148_v5, %v1145_v6 }
  0xd6   : > { %v1152_v8 = vunpack.c.l.b16 %v1150_v27  ;;  %v1153_v50 = vunpack.c.h.b16 %v1150_v27  ;;  %v1005_v10 = vpack.c.b16 %v1003_v7, %v583_v58  ;;  %v822_v20 = vsel %vm1853_vm9, %v1435_v0, %v821_v4 }
  0xd7   : > { %v826_v12 = vunpack.c.l.b16 %v822_v20 }
  0xd8   : > { %v1154_v15 = vpack.c.b16 %v1152_v8, %v1152_v8  ;;  %v1155_v16 = vpack.c.b16 %v1153_v50, %v1153_v50  ;;  %1439 = vmatmul.msk.bf16.gmra.mxu2 %vm598_vm6, %v1005_v10 }
  0xd9   : > { %v828_v9 = vpack.c.b16 %v826_v12, %v825_v14 }
  0xda   : > { %v1472_v18 = vrot.slane %v1154_v15, 9  ;;  %v1158_v19 = vrot.slane %v1155_v16, 5 }
  0xdb   : > { %1437 = vmatmul.msk.bf16.gmra.mxu1 %vm598_vm6, %v828_v9 }
  0xdc   : > { %v1159_v21 = vsel %vm1853_vm9, %v1472_v18, %v1158_v19 }
  0xdd   : > { %v1160_v22 = vunpack.c.l.b16 %v1159_v21 }
  0xdf   : > { %v1162_v23 = vpack.c.b16 %v1160_v22, %v826_v12 }
  0xe1   : > { %1474 = vmatmul.msk.bf16.gmra.mxu3 %vm598_vm6, %v1162_v23 }
 0x134   : > { %v1033_v44 = vpop.f32.mrf.mxu2 }
 0x135   : > { %v1034_v11 = vadd.f32 %v1912_v24, %v1033_v44 }
 0x137   : > { %v1047_v14 = vrot.slane %v1034_v11, 1  ;;  %v1048_v28 = vrot.slane %v1034_v11, 2  ;;  %v1049_v30 = vrot.slane %v1034_v11, 3  ;;  %1440 = vst.msk [vmem:[%s1917_s16 + $0x10] sm:$0x1] %vm684_vm10, %v1034_v11  ;;  %v1050_v31 = vrot.slane %v1034_v11, 4 }
 0x138   : > { %v1051_v32 = vrot.slane %v1034_v11, 5  ;;  %v1052_v33 = vrot.slane %v1034_v11, 6  ;;  %v1053_v34 = vrot.slane %v1034_v11, 7 }
 0x139   : > { %1441 = vst.msk [vmem:[%s1917_s16 + $0x12] sm:$0x1] %vm684_vm10, %v1047_v14 }
 0x13a   : > { %1442 = vst.msk [vmem:[%s1917_s16 + $0x14] sm:$0x1] %vm684_vm10, %v1048_v28  ;;  %v856_v26 = vpop.f32.mrf.mxu1 }
 0x13b   : > { %1443 = vst.msk [vmem:[%s1917_s16 + $0x16] sm:$0x1] %vm684_vm10, %v1049_v30  ;;  %v857_v35 = vadd.f32 %v1912_v24, %v856_v26 }
 0x13c   : > { %1444 = vst.msk [vmem:[%s1917_s16 + $0x18] sm:$0x1] %vm684_vm10, %v1050_v31  ;;  %v1035_v39 = vpop.f32.mrf.mxu2 }
 0x13d   : > { %1445 = vst.msk [vmem:[%s1917_s16 + $0x1a] sm:$0x1] %vm684_vm10, %v1051_v32  ;;  %v870_v37 = vrot.slane %v857_v35, 1  ;;  %v871_v38 = vrot.slane %v857_v35, 2  ;;  %v872_v40 = vrot.slane %v857_v35, 3  ;;  %v873_v41 = vrot.slane %v857_v35, 4  ;;  %v614_v48 = vpop.f32.mrf.mxu0 }
 0x13e   : > { %1446 = vst.msk [vmem:[%s1917_s16 + $0x1c] sm:$0x1] %vm684_vm10, %v1052_v33  ;;  %v874_v42 = vrot.slane %v857_v35, 5  ;;  %v1036_v43 = vadd.f32 %v1912_v24, %v1035_v39  ;;  %v875_v17 = vrot.slane %v857_v35, 6  ;;  %v876_v45 = vrot.slane %v857_v35, 7 }
 0x13f   : > { %1447 = vst.msk [vmem:[%s1917_s16 + $0x1e] sm:$0x1] %vm684_vm10, %v1053_v34  ;;  %v615_v13 = vadd.f32 %v1912_v24, %v614_v48 }
 0x140   : > { %926 = vst.msk [vmem:[%s1917_s16 + $0x1] sm:$0x1] %vm684_vm10, %v857_v35  ;;  %v1054_v46 = vrot.slane %v1036_v43, 1  ;;  %v1055_v47 = vrot.slane %v1036_v43, 2  ;;  %v1056_v49 = vrot.slane %v1036_v43, 3  ;;  %v1057_v52 = vrot.slane %v1036_v43, 4 }
 0x141   : > { %927 = vst.msk [vmem:[%s1917_s16 + $0x3] sm:$0x1] %vm684_vm10, %v870_v37  ;;  %v1058_v36 = vrot.slane %v1036_v43, 5  ;;  %v1059_v53 = vrot.slane %v1036_v43, 6  ;;  %v1060_v54 = vrot.slane %v1036_v43, 7  ;;  %v628_v55 = vrot.slane %v615_v13, 1 }
 0x142   : > { %928 = vst.msk [vmem:[%s1917_s16 + $0x5] sm:$0x1] %vm684_vm10, %v871_v38  ;;  %v629_v56 = vrot.slane %v615_v13, 2  ;;  %v858_v57 = vpop.f32.mrf.mxu1  ;;  %v630_v58 = vrot.slane %v615_v13, 3  ;;  %v631_v59 = vrot.slane %v615_v13, 4  ;;  %v632_v60 = vrot.slane %v615_v13, 5 }
 0x143   : > { %929 = vst.msk [vmem:[%s1917_s16 + $0x7] sm:$0x1] %vm684_vm10, %v872_v40  ;;  %v859_v61 = vadd.f32 %v1912_v24, %v858_v57  ;;  %v633_v62 = vrot.slane %v615_v13, 6  ;;  %v634_v63 = vrot.slane %v615_v13, 7 }
 0x144   : > { %930 = vst.msk [vmem:[%s1917_s16 + $0x9] sm:$0x1] %vm684_vm10, %v873_v41  ;;  %v1190_v29 = vpop.f32.mrf.mxu3 }
 0x145   : > { %931 = vst.msk [vmem:[%s1917_s16 + $0xb] sm:$0x1] %vm684_vm10, %v874_v42  ;;  %v877_v51 = vrot.slane %v859_v61, 1  ;;  %v878_v3 = vrot.slane %v859_v61, 2  ;;  %v879_v1 = vrot.slane %v859_v61, 3  ;;  %v880_v2 = vrot.slane %v859_v61, 4  ;;  %v616_v27 = vpop.f32.mrf.mxu0 }
 0x146   : > { %932 = vst.msk [vmem:[%s1917_s16 + $0xd] sm:$0x1] %vm684_vm10, %v875_v17  ;;  %v881_v25 = vrot.slane %v859_v61, 5  ;;  %v1191_v0 = vadd.f32 %v1912_v24, %v1190_v29  ;;  %v882_v4 = vrot.slane %v859_v61, 6  ;;  %v883_v5 = vrot.slane %v859_v61, 7 }
 0x147   : > { %933 = vst.msk [vmem:[%s1917_s16 + $0xf] sm:$0x1] %vm684_vm10, %v876_v45  ;;  %v617_v20 = vadd.f32 %v1912_v24, %v616_v27 }
 0x148   : > { %1448 = vst.msk [vmem:[%s1917_s16 + $0x30] sm:$0x1] %vm684_vm10, %v1036_v43  ;;  %v1204_v6 = vrot.slane %v1191_v0, 1  ;;  %v1205_v7 = vrot.slane %v1191_v0, 2  ;;  %v1206_v8 = vrot.slane %v1191_v0, 3  ;;  %v1207_v50 = vrot.slane %v1191_v0, 4 }
 0x149   : > { %1449 = vst.msk [vmem:[%s1917_s16 + $0x32] sm:$0x1] %vm684_vm10, %v1054_v46  ;;  %v1208_v10 = vrot.slane %v1191_v0, 5  ;;  %v1209_v12 = vrot.slane %v1191_v0, 6  ;;  %v1210_v15 = vrot.slane %v1191_v0, 7  ;;  %v635_v16 = vrot.slane %v617_v20, 1 }
 0x14a   : > { %1450 = vst.msk [vmem:[%s1917_s16 + $0x34] sm:$0x1] %vm684_vm10, %v1055_v47  ;;  %v636_v9 = vrot.slane %v617_v20, 2  ;;  %v637_v19 = vrot.slane %v617_v20, 3  ;;  %v638_v21 = vrot.slane %v617_v20, 4  ;;  %v639_v22 = vrot.slane %v617_v20, 5 }
 0x14b   : > { %1451 = vst.msk [vmem:[%s1917_s16 + $0x36] sm:$0x1] %vm684_vm10, %v1056_v49  ;;  %v640_v44 = vrot.slane %v617_v20, 6  ;;  %v641_v11 = vrot.slane %v617_v20, 7 }
 0x14c   : > { %1452 = vst.msk [vmem:[%s1917_s16 + $0x38] sm:$0x1] %vm684_vm10, %v1057_v52  ;;  %v1192_v18 = vpop.f32.mrf.mxu3 }
 0x14d   : > { %1453 = vst.msk [vmem:[%s1917_s16 + $0x3a] sm:$0x1] %vm684_vm10, %v1058_v36  ;;  %v1193_v23 = vadd.f32 %v1912_v24, %v1192_v18 }
 0x14e   : > { %1454 = vst.msk [vmem:[%s1917_s16 + $0x3c] sm:$0x1] %vm684_vm10, %v1059_v53  ;;  %v619_v14 = vpop.f32.mrf.mxu0 }
 0x14f   : > { %1455 = vst.msk [vmem:[%s1917_s16 + $0x3e] sm:$0x1] %vm684_vm10, %v1060_v54  ;;  %v1211_v28 = vrot.slane %v1193_v23, 1  ;;  %v1212_v30 = vrot.slane %v1193_v23, 2  ;;  %v1213_v31 = vrot.slane %v1193_v23, 3  ;;  %v1214_v32 = vrot.slane %v1193_v23, 4 }
 0x150   : > { %685 = vst.msk [vmem:[%s1917_s16] sm:$0x1] %vm684_vm10, %v615_v13  ;;  %v1215_v33 = vrot.slane %v1193_v23, 5  ;;  %v620_v26 = vadd.f32 %v1912_v24, %v619_v14  ;;  %v1216_v34 = vrot.slane %v1193_v23, 6  ;;  %v1217_v35 = vrot.slane %v1193_v23, 7 }
 0x151   : > { %686 = vst.msk [vmem:[%s1917_s16 + $0x2] sm:$0x1] %vm684_vm10, %v628_v55 }
 0x152   : > { %687 = vst.msk [vmem:[%s1917_s16 + $0x4] sm:$0x1] %vm684_vm10, %v629_v56  ;;  %v642_v37 = vrot.slane %v620_v26, 1  ;;  %v643_v38 = vrot.slane %v620_v26, 2  ;;  %v644_v40 = vrot.slane %v620_v26, 3  ;;  %v645_v41 = vrot.slane %v620_v26, 4 }
 0x153   : > { %688 = vst.msk [vmem:[%s1917_s16 + $0x6] sm:$0x1] %vm684_vm10, %v630_v58  ;;  %v646_v42 = vrot.slane %v620_v26, 5  ;;  %v647_v17 = vrot.slane %v620_v26, 6  ;;  %v648_v45 = vrot.slane %v620_v26, 7 }
 0x154   : > { %689 = vst.msk [vmem:[%s1917_s16 + $0x8] sm:$0x1] %vm684_vm10, %v631_v59 }
 0x155   : > { %690 = vst.msk [vmem:[%s1917_s16 + $0xa] sm:$0x1] %vm684_vm10, %v632_v60 }
 0x156   : > { %691 = vst.msk [vmem:[%s1917_s16 + $0xc] sm:$0x1] %vm684_vm10, %v633_v62  ;;  %v621_v39 = vpop.f32.mrf.mxu0 }
 0x157   : > { %692 = vst.msk [vmem:[%s1917_s16 + $0xe] sm:$0x1] %vm684_vm10, %v634_v63  ;;  %v622_v43 = vadd.f32 %v1912_v24, %v621_v39 }
 0x158   : > { %934 = vst.msk [vmem:[%s1917_s16 + $0x21] sm:$0x1] %vm684_vm10, %v859_v61  ;;  %v861_v48 = vpop.f32.mrf.mxu1 }
 0x159   : > { %935 = vst.msk [vmem:[%s1917_s16 + $0x23] sm:$0x1] %vm684_vm10, %v877_v51  ;;  %v649_v46 = vrot.slane %v622_v43, 1  ;;  %v650_v47 = vrot.slane %v622_v43, 2  ;;  %v651_v49 = vrot.slane %v622_v43, 3  ;;  %v652_v52 = vrot.slane %v622_v43, 4 }
 0x15a   : > { %936 = vst.msk [vmem:[%s1917_s16 + $0x25] sm:$0x1] %vm684_vm10, %v878_v3  ;;  %v653_v36 = vrot.slane %v622_v43, 5  ;;  %v862_v13 = vadd.f32 %v1912_v24, %v861_v48  ;;  %v654_v53 = vrot.slane %v622_v43, 6  ;;  %v655_v54 = vrot.slane %v622_v43, 7 }
 0x15b   : > { %937 = vst.msk [vmem:[%s1917_s16 + $0x27] sm:$0x1] %vm684_vm10, %v879_v1  ;;  %v1038_v57 = vpop.f32.mrf.mxu2 }
 0x15c   : > { %938 = vst.msk [vmem:[%s1917_s16 + $0x29] sm:$0x1] %vm684_vm10, %v880_v2  ;;  %v884_v55 = vrot.slane %v862_v13, 1  ;;  %v885_v56 = vrot.slane %v862_v13, 2  ;;  %v886_v58 = vrot.slane %v862_v13, 3  ;;  %v887_v59 = vrot.slane %v862_v13, 4 }
 0x15d   : > { %939 = vst.msk [vmem:[%s1917_s16 + $0x2b] sm:$0x1] %vm684_vm10, %v881_v25  ;;  %v888_v60 = vrot.slane %v862_v13, 5  ;;  %v1039_v61 = vadd.f32 %v1912_v24, %v1038_v57  ;;  %v889_v62 = vrot.slane %v862_v13, 6  ;;  %v890_v63 = vrot.slane %v862_v13, 7 }
 0x15e   : > { %940 = vst.msk [vmem:[%s1917_s16 + $0x2d] sm:$0x1] %vm684_vm10, %v882_v4 }
 0x15f   : > { %941 = vst.msk [vmem:[%s1917_s16 + $0x2f] sm:$0x1] %vm684_vm10, %v883_v5  ;;  %v1061_v51 = vrot.slane %v1039_v61, 1  ;;  %v1062_v3 = vrot.slane %v1039_v61, 2  ;;  %v1063_v1 = vrot.slane %v1039_v61, 3  ;;  %v1064_v2 = vrot.slane %v1039_v61, 4 }
 0x160   : > { %1475 = vst.msk [vmem:[%s1917_s16 + $0x11] sm:$0x1] %vm684_vm10, %v1191_v0  ;;  %v863_v29 = vpop.f32.mrf.mxu1  ;;  %v1065_v25 = vrot.slane %v1039_v61, 5  ;;  %v1066_v4 = vrot.slane %v1039_v61, 6  ;;  %v1067_v5 = vrot.slane %v1039_v61, 7 }
 0x161   : > { %1476 = vst.msk [vmem:[%s1917_s16 + $0x13] sm:$0x1] %vm684_vm10, %v1204_v6  ;;  %v864_v0 = vadd.f32 %v1912_v24, %v863_v29 }
 0x162   : > { %1477 = vst.msk [vmem:[%s1917_s16 + $0x15] sm:$0x1] %vm684_vm10, %v1205_v7 }
 0x163   : > { %1478 = vst.msk [vmem:[%s1917_s16 + $0x17] sm:$0x1] %vm684_vm10, %v1206_v8  ;;  %v891_v6 = vrot.slane %v864_v0, 1  ;;  %v892_v7 = vrot.slane %v864_v0, 2  ;;  %v1040_v27 = vpop.f32.mrf.mxu2  ;;  %v893_v8 = vrot.slane %v864_v0, 3 }
 0x164   : > { %1479 = vst.msk [vmem:[%s1917_s16 + $0x19] sm:$0x1] %vm684_vm10, %v1207_v50  ;;  %v894_v50 = vrot.slane %v864_v0, 4 }
 0x165   : > { %1480 = vst.msk [vmem:[%s1917_s16 + $0x1b] sm:$0x1] %vm684_vm10, %v1208_v10  ;;  %v895_v10 = vrot.slane %v864_v0, 5 }
 0x166   : > { %1481 = vst.msk [vmem:[%s1917_s16 + $0x1d] sm:$0x1] %vm684_vm10, %v1209_v12  ;;  %v896_v12 = vrot.slane %v864_v0, 6 }
 0x167   : > { %1482 = vst.msk [vmem:[%s1917_s16 + $0x1f] sm:$0x1] %vm684_vm10, %v1210_v15  ;;  %v897_v15 = vrot.slane %v864_v0, 7 }
 0x168   : > { %693 = vst.msk [vmem:[%s1917_s16 + $0x20] sm:$0x1] %vm684_vm10, %v617_v20  ;;  %v1041_v20 = vadd.f32 %v1912_v24, %v1040_v27 }
 0x169   : > { %694 = vst.msk [vmem:[%s1917_s16 + $0x22] sm:$0x1] %vm684_vm10, %v635_v16  ;;  %v1195_v16 = vpop.f32.mrf.mxu3 }
 0x16a   : > { %695 = vst.msk [vmem:[%s1917_s16 + $0x24] sm:$0x1] %vm684_vm10, %v636_v9  ;;  %v1068_v9 = vrot.slane %v1041_v20, 1  ;;  %v1069_v18 = vrot.slane %v1041_v20, 2 }
 0x16b   : > { %696 = vst.msk [vmem:[%s1917_s16 + $0x26] sm:$0x1] %vm684_vm10, %v637_v19  ;;  %v1070_v19 = vrot.slane %v1041_v20, 3 }
 0x16c   : > { %697 = vst.msk [vmem:[%s1917_s16 + $0x28] sm:$0x1] %vm684_vm10, %v638_v21  ;;  %v1071_v21 = vrot.slane %v1041_v20, 4 }
 0x16d   : > { %698 = vst.msk [vmem:[%s1917_s16 + $0x2a] sm:$0x1] %vm684_vm10, %v639_v22  ;;  %v1072_v22 = vrot.slane %v1041_v20, 5 }
 0x16e   : > { %699 = vst.msk [vmem:[%s1917_s16 + $0x2c] sm:$0x1] %vm684_vm10, %v640_v44  ;;  %v1073_v44 = vrot.slane %v1041_v20, 6 }
 0x16f   : > { %700 = vst.msk [vmem:[%s1917_s16 + $0x2e] sm:$0x1] %vm684_vm10, %v641_v11  ;;  %v1074_v11 = vrot.slane %v1041_v20, 7 }
 0x170   : > { %1483 = vst.msk [vmem:[%s1917_s16 + $0x31] sm:$0x1] %vm684_vm10, %v1193_v23  ;;  %v1196_v23 = vadd.f32 %v1912_v24, %v1195_v16 }
 0x171   : > { %1484 = vst.msk [vmem:[%s1917_s16 + $0x33] sm:$0x1] %vm684_vm10, %v1211_v28 }
 0x172   : > { %1485 = vst.msk [vmem:[%s1917_s16 + $0x35] sm:$0x1] %vm684_vm10, %v1212_v30  ;;  %v1218_v14 = vrot.slane %v1196_v23, 1  ;;  %v1219_v28 = vrot.slane %v1196_v23, 2  ;;  %v1197_v30 = vpop.f32.mrf.mxu3 }
 0x173   : > { %1486 = vst.msk [vmem:[%s1917_s16 + $0x37] sm:$0x1] %vm684_vm10, %v1213_v31  ;;  %v1220_v31 = vrot.slane %v1196_v23, 3 }
 0x174   : > { %1487 = vst.msk [vmem:[%s1917_s16 + $0x39] sm:$0x1] %vm684_vm10, %v1214_v32  ;;  %v1221_v32 = vrot.slane %v1196_v23, 4 }
 0x175   : > { %1488 = vst.msk [vmem:[%s1917_s16 + $0x3b] sm:$0x1] %vm684_vm10, %v1215_v33  ;;  %v1222_v33 = vrot.slane %v1196_v23, 5 }
 0x176   : > { %1489 = vst.msk [vmem:[%s1917_s16 + $0x3d] sm:$0x1] %vm684_vm10, %v1216_v34  ;;  %v1223_v34 = vrot.slane %v1196_v23, 6 }
 0x177   : > { %1490 = vst.msk [vmem:[%s1917_s16 + $0x3f] sm:$0x1] %vm684_vm10, %v1217_v35  ;;  %v1224_v35 = vrot.slane %v1196_v23, 7 }
 0x178   : > { %701 = vst.msk [vmem:[%s1917_s16 + $0x40] sm:$0x1] %vm684_vm10, %v620_v26  ;;  %v1198_v26 = vadd.f32 %v1912_v24, %v1197_v30 }
 0x179   : > { %702 = vst.msk [vmem:[%s1917_s16 + $0x42] sm:$0x1] %vm684_vm10, %v642_v37 }
 0x17a   : > { %703 = vst.msk [vmem:[%s1917_s16 + $0x44] sm:$0x1] %vm684_vm10, %v643_v38  ;;  %v1225_v37 = vrot.slane %v1198_v26, 1  ;;  %v1226_v24 = vrot.slane %v1198_v26, 2  ;;  %v1227_v38 = vrot.slane %v1198_v26, 3  ;;  %v1228_v39 = vrot.slane %v1198_v26, 4 }
 0x17b   : > { %704 = vst.msk [vmem:[%s1917_s16 + $0x46] sm:$0x1] %vm684_vm10, %v644_v40  ;;  %v1229_v40 = vrot.slane %v1198_v26, 5 }
 0x17c   : > { %705 = vst.msk [vmem:[%s1917_s16 + $0x48] sm:$0x1] %vm684_vm10, %v645_v41  ;;  %v1230_v41 = vrot.slane %v1198_v26, 6 }
 0x17d   : > { %706 = vst.msk [vmem:[%s1917_s16 + $0x4a] sm:$0x1] %vm684_vm10, %v646_v42  ;;  %v1231_v42 = vrot.slane %v1198_v26, 7 }
 0x17e   : > { %707 = vst.msk [vmem:[%s1917_s16 + $0x4c] sm:$0x1] %vm684_vm10, %v647_v17 }
 0x17f   : > { %708 = vst.msk [vmem:[%s1917_s16 + $0x4e] sm:$0x1] %vm684_vm10, %v648_v45 }
 0x180   : > { %709 = vst.msk [vmem:[%s1917_s16 + $0x60] sm:$0x1] %vm684_vm10, %v622_v43 }
 0x181   : > { %710 = vst.msk [vmem:[%s1917_s16 + $0x62] sm:$0x1] %vm684_vm10, %v649_v46 }
 0x182   : > { %711 = vst.msk [vmem:[%s1917_s16 + $0x64] sm:$0x1] %vm684_vm10, %v650_v47 }
 0x183   : > { %712 = vst.msk [vmem:[%s1917_s16 + $0x66] sm:$0x1] %vm684_vm10, %v651_v49 }
 0x184   : > { %713 = vst.msk [vmem:[%s1917_s16 + $0x68] sm:$0x1] %vm684_vm10, %v652_v52 }
 0x185   : > { %714 = vst.msk [vmem:[%s1917_s16 + $0x6a] sm:$0x1] %vm684_vm10, %v653_v36 }
 0x186   : > { %715 = vst.msk [vmem:[%s1917_s16 + $0x6c] sm:$0x1] %vm684_vm10, %v654_v53 }
 0x187   : > { %716 = vst.msk [vmem:[%s1917_s16 + $0x6e] sm:$0x1] %vm684_vm10, %v655_v54 }
 0x188   : > { %942 = vst.msk [vmem:[%s1917_s16 + $0x41] sm:$0x1] %vm684_vm10, %v862_v13 }
 0x189   : > { %943 = vst.msk [vmem:[%s1917_s16 + $0x43] sm:$0x1] %vm684_vm10, %v884_v55 }
 0x18a   : > { %944 = vst.msk [vmem:[%s1917_s16 + $0x45] sm:$0x1] %vm684_vm10, %v885_v56 }
 0x18b   : > { %945 = vst.msk [vmem:[%s1917_s16 + $0x47] sm:$0x1] %vm684_vm10, %v886_v58 }
 0x18c   : > { %946 = vst.msk [vmem:[%s1917_s16 + $0x49] sm:$0x1] %vm684_vm10, %v887_v59 }
 0x18d   : > { %947 = vst.msk [vmem:[%s1917_s16 + $0x4b] sm:$0x1] %vm684_vm10, %v888_v60 }
 0x18e   : > { %948 = vst.msk [vmem:[%s1917_s16 + $0x4d] sm:$0x1] %vm684_vm10, %v889_v62 }
 0x18f   : > { %949 = vst.msk [vmem:[%s1917_s16 + $0x4f] sm:$0x1] %vm684_vm10, %v890_v63 }
 0x190   : > { %1456 = vst.msk [vmem:[%s1917_s16 + $0x50] sm:$0x1] %vm684_vm10, %v1039_v61 }
 0x191   : > { %1457 = vst.msk [vmem:[%s1917_s16 + $0x52] sm:$0x1] %vm684_vm10, %v1061_v51 }
 0x192   : > { %1458 = vst.msk [vmem:[%s1917_s16 + $0x54] sm:$0x1] %vm684_vm10, %v1062_v3 }
 0x193   : > { %1459 = vst.msk [vmem:[%s1917_s16 + $0x56] sm:$0x1] %vm684_vm10, %v1063_v1 }
 0x194   : > { %1460 = vst.msk [vmem:[%s1917_s16 + $0x58] sm:$0x1] %vm684_vm10, %v1064_v2 }
 0x195   : > { %1461 = vst.msk [vmem:[%s1917_s16 + $0x5a] sm:$0x1] %vm684_vm10, %v1065_v25 }
 0x196   : > { %1462 = vst.msk [vmem:[%s1917_s16 + $0x5c] sm:$0x1] %vm684_vm10, %v1066_v4 }
 0x197   : > { %1463 = vst.msk [vmem:[%s1917_s16 + $0x5e] sm:$0x1] %vm684_vm10, %v1067_v5 }
 0x198   : > { %950 = vst.msk [vmem:[%s1917_s16 + $0x61] sm:$0x1] %vm684_vm10, %v864_v0 }
 0x199   : > { %951 = vst.msk [vmem:[%s1917_s16 + $0x63] sm:$0x1] %vm684_vm10, %v891_v6 }
 0x19a   : > { %952 = vst.msk [vmem:[%s1917_s16 + $0x65] sm:$0x1] %vm684_vm10, %v892_v7 }
 0x19b   : > { %953 = vst.msk [vmem:[%s1917_s16 + $0x67] sm:$0x1] %vm684_vm10, %v893_v8 }
 0x19c   : > { %954 = vst.msk [vmem:[%s1917_s16 + $0x69] sm:$0x1] %vm684_vm10, %v894_v50 }
 0x19d   : > { %955 = vst.msk [vmem:[%s1917_s16 + $0x6b] sm:$0x1] %vm684_vm10, %v895_v10 }
 0x19e   : > { %956 = vst.msk [vmem:[%s1917_s16 + $0x6d] sm:$0x1] %vm684_vm10, %v896_v12 }
 0x19f   : > { %957 = vst.msk [vmem:[%s1917_s16 + $0x6f] sm:$0x1] %vm684_vm10, %v897_v15 }
 0x1a0   : > { %1464 = vst.msk [vmem:[%s1917_s16 + $0x70] sm:$0x1] %vm684_vm10, %v1041_v20 }
 0x1a1   : > { %1465 = vst.msk [vmem:[%s1917_s16 + $0x72] sm:$0x1] %vm684_vm10, %v1068_v9 }
 0x1a2   : > { %1466 = vst.msk [vmem:[%s1917_s16 + $0x74] sm:$0x1] %vm684_vm10, %v1069_v18 }
 0x1a3   : > { %1467 = vst.msk [vmem:[%s1917_s16 + $0x76] sm:$0x1] %vm684_vm10, %v1070_v19 }
 0x1a4   : > { %1468 = vst.msk [vmem:[%s1917_s16 + $0x78] sm:$0x1] %vm684_vm10, %v1071_v21 }
 0x1a5   : > { %1469 = vst.msk [vmem:[%s1917_s16 + $0x7a] sm:$0x1] %vm684_vm10, %v1072_v22 }
 0x1a6   : > { %1470 = vst.msk [vmem:[%s1917_s16 + $0x7c] sm:$0x1] %vm684_vm10, %v1073_v44 }
 0x1a7   : > { %1471 = vst.msk [vmem:[%s1917_s16 + $0x7e] sm:$0x1] %vm684_vm10, %v1074_v11 }
 0x1a8   : > { %1491 = vst.msk [vmem:[%s1917_s16 + $0x51] sm:$0x1] %vm684_vm10, %v1196_v23 }
 0x1a9   : > { %1492 = vst.msk [vmem:[%s1917_s16 + $0x53] sm:$0x1] %vm684_vm10, %v1218_v14 }
 0x1aa   : > { %1493 = vst.msk [vmem:[%s1917_s16 + $0x55] sm:$0x1] %vm684_vm10, %v1219_v28 }
 0x1ab   : > { %1494 = vst.msk [vmem:[%s1917_s16 + $0x57] sm:$0x1] %vm684_vm10, %v1220_v31 }
 0x1ac   : > { %1495 = vst.msk [vmem:[%s1917_s16 + $0x59] sm:$0x1] %vm684_vm10, %v1221_v32 }
 0x1ad   : > { %1496 = vst.msk [vmem:[%s1917_s16 + $0x5b] sm:$0x1] %vm684_vm10, %v1222_v33 }
 0x1ae   : > { %1497 = vst.msk [vmem:[%s1917_s16 + $0x5d] sm:$0x1] %vm684_vm10, %v1223_v34 }
 0x1af   : > { %1498 = vst.msk [vmem:[%s1917_s16 + $0x5f] sm:$0x1] %vm684_vm10, %v1224_v35 }
 0x1b0   : > { %1499 = vst.msk [vmem:[%s1917_s16 + $0x71] sm:$0x1] %vm684_vm10, %v1198_v26 }
 0x1b1   : > { %1500 = vst.msk [vmem:[%s1917_s16 + $0x73] sm:$0x1] %vm684_vm10, %v1225_v37 }
 0x1b2   : > { %1501 = vst.msk [vmem:[%s1917_s16 + $0x75] sm:$0x1] %vm684_vm10, %v1226_v24 }
 0x1b3   : > { %1502 = vst.msk [vmem:[%s1917_s16 + $0x77] sm:$0x1] %vm684_vm10, %v1227_v38 }
 0x1b4   : > { %1503 = vst.msk [vmem:[%s1917_s16 + $0x79] sm:$0x1] %vm684_vm10, %v1228_v39 }
 0x1b5   : > { %1504 = vst.msk [vmem:[%s1917_s16 + $0x7b] sm:$0x1] %vm684_vm10, %v1229_v40 }
 0x1b6   : > { %1505 = vst.msk [vmem:[%s1917_s16 + $0x7d] sm:$0x1] %vm684_vm10, %v1230_v41 }
 0x1b7   : > { %1506 = vst.msk [vmem:[%s1917_s16 + $0x7f] sm:$0x1] %vm684_vm10, %v1231_v42 }
 0x1b8 PF: > { %s14_s19 = sadd.s32 1, %s1601_s19   ;;  %s2216_s15 = smov %s1593_s17 }
 0x1b9   : > { %p11_p9 = scmp.ge.s32.totalorder %s14_s19, 6   ;;  %s2217_s16 = smov %s1597_s18 }
 0x1ba   : > { %s2218_s17 = smov %s2221_s20  ;;  %s2219_s18 = smov %s2225_s21 }
 0x1bb   :  { %13 = sbr.rel (!%p11_p9) target bundleno = 3 (0x3), region = 70 }

</bundles_post_ra>
